<compile_context>
chip_gen: v7x
topology: tpu7x:2x2x1
jax: 0.10.0
libtpu: 0.0.40
codegen_flags: <defaults>
</compile_context>

<pallas_src>
import functools

import jax
import jax.numpy as jnp
from jax.experimental import pallas as pl
from jax.experimental.pallas import tpu as pltpu


def _bidaf_kernel(c_ref, q_ref, w_ref, g_ref, *, j_valid, jp, d):
    """BiDAF attention flow for a (BB, T, D) block of batch elements.

    c_ref: (BB, T, D)    context encodings (BERT hidden states)
    q_ref: (BB, Jp, D)   question encodings, zero-padded along J to Jp
    w_ref: (3, D)        trilinear similarity weights [w_c; w_q; w_cq]
    g_ref: (BB, T, 4*D)  BiDAF output G = [C ; C2Q ; C*C2Q ; C*Q2C]
    """
    c = c_ref[...].astype(jnp.float32)            # (BB, T, D)
    q = q_ref[...].astype(jnp.float32)            # (BB, Jp, D)
    w_c = w_ref[0:1, :].astype(jnp.float32)       # (1, D)
    w_q = w_ref[1:2, :].astype(jnp.float32)       # (1, D)
    w_cq = w_ref[2:3, :].astype(jnp.float32)      # (1, D)

    # Bias terms of the trilinear similarity as VPU multiply + lane reduce
    # (avoids two degenerate N=1 MXU matmuls pushing near-empty result tiles).
    s_c = jnp.sum(c * w_c, axis=-1, keepdims=True)           # (BB, T, 1)
    s_q = jnp.sum(q * w_q, axis=-1)                           # (BB, Jp)

    # Main trilinear term on the MXU: bf16 operands, f32 accumulation.
    cw = (c * w_cq).astype(jnp.bfloat16)                      # (BB, T, D)
    qb = q.astype(jnp.bfloat16)                               # (BB, Jp, D)
    s = jnp.einsum("btd,bjd->btj", cw, qb,
                   preferred_element_type=jnp.float32)        # (BB, T, Jp)
    s = s + s_c + s_q[:, None, :]

    # Mask the zero-padded question columns before the softmaxes.
    if j_valid < jp:
        col = jax.lax.broadcasted_iota(jnp.int32, (1, 1, jp), 2)
        s = jnp.where(col < j_valid, s, jnp.float32(-1e30))

    # Context-to-query attention: softmax over the (padded) question axis.
    m_row = jnp.max(s, axis=-1, keepdims=True)                # (BB, T, 1)
    e_row = jnp.exp(s - m_row)
    a = e_row * pl.reciprocal(
        jnp.sum(e_row, axis=-1, keepdims=True), approx=True)  # (BB, T, Jp)
    c2q = jnp.einsum("btj,bjd->btd", a.astype(jnp.bfloat16), qb,
                     preferred_element_type=jnp.float32)      # (BB, T, D)

    # Query-to-context attention: softmax over T of max_j S.  m_row is
    # exactly max_j S, so reuse it (no duplicate cross-lane reduction).
    m_col = jnp.max(m_row, axis=1, keepdims=True)             # (BB, 1, 1)
    e_col = jnp.exp(m_row - m_col)                            # (BB, T, 1)
    beta = e_col * pl.reciprocal(
        jnp.sum(e_col, axis=1, keepdims=True), approx=True)   # (BB, T, 1)
    h = jnp.sum(beta * c, axis=1, keepdims=True)              # (BB, 1, D)

    # Write the four G segments directly as lane-dense slice stores (each
    # segment is D wide and starts at a multiple of 128 lanes) — no concat,
    # no explicit broadcast of h.
    out_dtype = g_ref.dtype
    g_ref[:, :, 0:d] = c.astype(out_dtype)
    g_ref[:, :, d:2 * d] = c2q.astype(out_dtype)
    g_ref[:, :, 2 * d:3 * d] = (c * c2q).astype(out_dtype)
    g_ref[:, :, 3 * d:4 * d] = (c * h).astype(out_dtype)      # implicit bcast


def bidaf_attention(context, query, w_sim, *, block_b=None, out_dtype=None):
    """BiDAF attention flow over BERT-style encodings.

    context: (B, T, D), query: (B, J, D), w_sim: (3, D)  ->  G: (B, T, 4*D)
    """
    B, T, D = context.shape
    Bq, J, Dq = query.shape
    assert (Bq, Dq) == (B, D)
    assert w_sim.shape == (3, D)
    if out_dtype is None:
        out_dtype = context.dtype   # emit output in the input dtype

    # Batch several elements per grid step to amortize per-step pipeline
    # overhead, while keeping >= 2 grid steps so the parallel batch axis can
    # be sharded across v7x's two TensorCores (and megacore on v5e/v6e).
    if block_b is None:
        block_b = B
        if B >= 2:
            block_b = B // 2
            while B % block_b != 0:
                block_b -= 1
    assert B % block_b == 0
    grid_b = B // block_b

    # Pad the question axis to a lane-dense multiple of 128 so the S matmul,
    # the row softmax and the A@Q matmul use full vregs / MXU columns.
    jp = max(128, int(pl.cdiv(J, 128)) * 128)
    if jp != J:
        query = jnp.pad(query, ((0, 0), (0, jp - J), (0, 0)))

    kernel = functools.partial(_bidaf_kernel, j_valid=J, jp=jp, d=D)

    return pl.pallas_call(
        kernel,
        out_shape=jax.ShapeDtypeStruct((B, T, 4 * D), out_dtype),
        grid_spec=pltpu.PrefetchScalarGridSpec(
            num_scalar_prefetch=0,
            grid=(grid_b,),
            in_specs=[
                pl.BlockSpec((block_b, T, D), lambda b: (b, 0, 0)),
                pl.BlockSpec((block_b, jp, D), lambda b: (b, 0, 0)),
                pl.BlockSpec((3, D), lambda b: (0, 0)),
            ],
            out_specs=pl.BlockSpec((block_b, T, 4 * D), lambda b: (b, 0, 0)),
        ),
        compiler_params=pltpu.CompilerParams(
            dimension_semantics=("parallel",),
            # Tiles are small; keep the scoped-VMEM request modest so the same
            # tiling also fits v7x's 64 MiB (32 MiB default scoped) VMEM.
            vmem_limit_bytes=32 * 1024 * 1024,
        ),
    )(context, query, w_sim)


def bidaf_reference(context, query, w_sim):
    """Plain-JAX f32 reference of the same BiDAF attention flow."""
    w_c, w_q, w_cq = w_sim[0], w_sim[1], w_sim[2]
    s = (jnp.einsum("btd,bjd->btj", context * w_cq[None, None, :], query)
         + jnp.einsum("btd,d->bt", context, w_c)[:, :, None]
         + jnp.einsum("bjd,d->bj", query, w_q)[:, None, :])
    a = jax.nn.softmax(s, axis=-1)
    c2q = jnp.einsum("btj,bjd->btd", a, query)
    b = jax.nn.softmax(jnp.max(s, axis=-1), axis=-1)          # (B, T)
    h = jnp.einsum("bt,btd->bd", b, context)[:, None, :]      # (B, 1, D)
    q2c = jnp.broadcast_to(h, context.shape)
    return jnp.concatenate(
        [context, c2q, context * c2q, context * q2c], axis=-1)


if __name__ == "__main__":
    # Small shapes consistent with a (tiny) BERT encoder output.
    B, T, J, D = 8, 16, 8, 128   # batch, context len, question len, hidden

    key = jax.random.PRNGKey(0)
    k_ctx, k_qry, k_w = jax.random.split(key, 3)

    # Stand-ins for BERT contextual encodings of passage and question.
    context = jax.random.normal(k_ctx, (B, T, D), dtype=jnp.float32)
    query = jax.random.normal(k_qry, (B, J, D), dtype=jnp.float32)
    # Deterministic init of the trilinear similarity weights [w_c; w_q; w_cq].
    w_sim = jax.random.normal(k_w, (3, D), dtype=jnp.float32) * (1.0 / jnp.sqrt(D))

    out = jax.block_until_ready(bidaf_attention(context, query, w_sim))
    ref = jax.block_until_ready(bidaf_reference(context, query, w_sim))

    assert out.shape == (B, T, 4 * D)
    # The kernel uses bf16 MXU operands + EUP approximate reciprocal, so
    # compare against the f32 reference with a correspondingly loose tolerance.
    max_err = float(jnp.max(jnp.abs(out - ref)))
    assert jnp.allclose(out, ref, atol=5e-2, rtol=5e-2), (
        f"mismatch vs reference: max abs err = {max_err}")

    print("KERNEL_OK")
</pallas_src>

<mosaic_0001>
module attributes {stable_mosaic.version = 11 : i64} {
  func.func @_bidaf_kernel(%arg0: i32, %arg1: memref<4x16x128xf32, #tpu.memory_space<vmem>>, %arg2: memref<4x128x128xf32, #tpu.memory_space<vmem>>, %arg3: memref<3x128xf32, #tpu.memory_space<vmem>>, %arg4: memref<4x16x512xf32, #tpu.memory_space<vmem>>) attributes {dimension_semantics = [#tpu.dimension_semantics<parallel>], iteration_bounds = array<i64: 2>, scalar_prefetch = 0 : i64, scratch_operands = 0 : i64, tpu.core_type = #tpu.core_type<tc>, window_params = [{transform_indices = @transform_0, window_bounds = array<i64: 4, 16, 128>}, {transform_indices = @transform_1, window_bounds = array<i64: 4, 128, 128>}, {pipeline_mode = #tpu.pipeline_mode<synchronous>, transform_indices = @transform_2, window_bounds = array<i64: 3, 128>}, {transform_indices = @transform_3, window_bounds = array<i64: 4, 16, 512>}]} {
    %c0 = arith.constant 0 : index
    %c0_0 = arith.constant 0 : index
    %c0_1 = arith.constant 0 : index
    %0 = vector.load %arg1[%c0, %c0_0, %c0_1] : memref<4x16x128xf32, #tpu.memory_space<vmem>>, vector<4x16x128xf32>
    %c0_2 = arith.constant 0 : index
    %c0_3 = arith.constant 0 : index
    %c0_4 = arith.constant 0 : index
    %1 = vector.load %arg2[%c0_2, %c0_3, %c0_4] : memref<4x128x128xf32, #tpu.memory_space<vmem>>, vector<4x128x128xf32>
    %c0_5 = arith.constant 0 : index
    %c0_6 = arith.constant 0 : index
    %2 = vector.load %arg3[%c0_5, %c0_6] : memref<3x128xf32, #tpu.memory_space<vmem>>, vector<1x128xf32>
    %c1 = arith.constant 1 : index
    %c0_7 = arith.constant 0 : index
    %3 = vector.load %arg3[%c1, %c0_7] : memref<3x128xf32, #tpu.memory_space<vmem>>, vector<1x128xf32>
    %c2 = arith.constant 2 : index
    %c0_8 = arith.constant 0 : index
    %4 = vector.load %arg3[%c2, %c0_8] : memref<3x128xf32, #tpu.memory_space<vmem>>, vector<1x128xf32>
    %5 = vector.shape_cast %2 : vector<1x128xf32> to vector<1x1x128xf32>
    %6 = vector.broadcast %5 : vector<1x1x128xf32> to vector<4x16x128xf32>
    %7 = arith.mulf %0, %6 : vector<4x16x128xf32>
    %cst = arith.constant dense<0.000000e+00> : vector<4x16xf32>
    %8 = vector.multi_reduction <add>, %7, %cst [2] : vector<4x16x128xf32> to vector<4x16xf32>
    %9 = vector.shape_cast %8 : vector<4x16xf32> to vector<4x16x1xf32>
    %10 = vector.shape_cast %3 : vector<1x128xf32> to vector<1x1x128xf32>
    %11 = vector.broadcast %10 : vector<1x1x128xf32> to vector<4x128x128xf32>
    %12 = arith.mulf %1, %11 : vector<4x128x128xf32>
    %cst_9 = arith.constant dense<0.000000e+00> : vector<4x128xf32>
    %13 = vector.multi_reduction <add>, %12, %cst_9 [2] : vector<4x128x128xf32> to vector<4x128xf32>
    %14 = vector.shape_cast %4 : vector<1x128xf32> to vector<1x1x128xf32>
    %15 = vector.broadcast %14 : vector<1x1x128xf32> to vector<4x16x128xf32>
    %16 = arith.mulf %0, %15 : vector<4x16x128xf32>
    %17 = arith.truncf %16 : vector<4x16x128xf32> to vector<4x16x128xbf16>
    %18 = arith.truncf %1 : vector<4x128x128xf32> to vector<4x128x128xbf16>
    "tpu.trace_start"() <{level = 10 : i32, message = "btd,bjd->btj"}> : () -> ()
    %cst_10 = arith.constant dense<0.000000e+00> : vector<4x16x128xf32>
    %19 = tpu.matmul %17, %18, %cst_10 {dimension_numbers = #tpu.dot_dimension_numbers<[2], [2], [1], [1], [0, 0, 0, 1, 1, 1], [0], [0]>} : vector<4x16x128xbf16>, vector<4x128x128xbf16>, vector<4x16x128xf32> -> vector<4x16x128xf32>
    "tpu.trace_stop"() : () -> ()
    %20 = vector.broadcast %9 : vector<4x16x1xf32> to vector<4x16x128xf32>
    %21 = arith.addf %19, %20 : vector<4x16x128xf32>
    %22 = vector.shape_cast %13 : vector<4x128xf32> to vector<4x1x128xf32>
    %23 = vector.broadcast %22 : vector<4x1x128xf32> to vector<4x16x128xf32>
    %24 = arith.addf %21, %23 : vector<4x16x128xf32>
    %25 = tpu.iota {dimensions = array<i32: 2>} : vector<1x1x128xi32>
    %c8_i32 = arith.constant 8 : i32
    %26 = vector.broadcast %c8_i32 : i32 to vector<1x1x128xi32>
    %27 = arith.cmpi slt, %25, %26 : vector<1x1x128xi32>
    %cst_11 = arith.constant -1.000000e+30 : f32
    %28 = vector.shape_cast %27 : vector<1x1x128xi1> to vector<1x1x128xi1>
    %29 = vector.broadcast %28 : vector<1x1x128xi1> to vector<4x16x128xi1>
    %30 = vector.broadcast %cst_11 : f32 to vector<4x16x128xf32>
    %31 = arith.select %29, %24, %30 : vector<4x16x128xi1>, vector<4x16x128xf32>
    %cst_12 = arith.constant dense<0xFF800000> : vector<4x16xf32>
    %32 = vector.multi_reduction <maximumf>, %31, %cst_12 [2] : vector<4x16x128xf32> to vector<4x16xf32>
    %33 = vector.shape_cast %32 : vector<4x16xf32> to vector<4x16x1xf32>
    %34 = vector.broadcast %33 : vector<4x16x1xf32> to vector<4x16x128xf32>
    %35 = arith.subf %31, %34 : vector<4x16x128xf32>
    %36 = math.exp %35 : vector<4x16x128xf32>
    %cst_13 = arith.constant dense<0.000000e+00> : vector<4x16xf32>
    %37 = vector.multi_reduction <add>, %36, %cst_13 [2] : vector<4x16x128xf32> to vector<4x16xf32>
    %38 = vector.shape_cast %37 : vector<4x16xf32> to vector<4x16x1xf32>
    %39 = tpu.reciprocal %38 {approx = true} : vector<4x16x1xf32> -> vector<4x16x1xf32>
    %40 = vector.broadcast %39 : vector<4x16x1xf32> to vector<4x16x128xf32>
    %41 = arith.mulf %36, %40 : vector<4x16x128xf32>
    %42 = arith.truncf %41 : vector<4x16x128xf32> to vector<4x16x128xbf16>
    "tpu.trace_start"() <{level = 10 : i32, message = "btj,bjd->btd"}> : () -> ()
    %cst_14 = arith.constant dense<0.000000e+00> : vector<4x16x128xf32>
    %43 = tpu.matmul %42, %18, %cst_14 {dimension_numbers = #tpu.dot_dimension_numbers<[2], [1], [1], [2], [0, 0, 0, 1, 1, 2], [0], [0]>} : vector<4x16x128xbf16>, vector<4x128x128xbf16>, vector<4x16x128xf32> -> vector<4x16x128xf32>
    "tpu.trace_stop"() : () -> ()
    %cst_15 = arith.constant dense<0xFF800000> : vector<4x1xf32>
    %44 = vector.multi_reduction <maximumf>, %33, %cst_15 [1] : vector<4x16x1xf32> to vector<4x1xf32>
    %45 = vector.shape_cast %44 : vector<4x1xf32> to vector<4x1x1xf32>
    %46 = vector.broadcast %45 : vector<4x1x1xf32> to vector<4x16x1xf32>
    %47 = arith.subf %33, %46 : vector<4x16x1xf32>
    %48 = math.exp %47 : vector<4x16x1xf32>
    %cst_16 = arith.constant dense<0.000000e+00> : vector<4x1xf32>
    %49 = vector.multi_reduction <add>, %48, %cst_16 [1] : vector<4x16x1xf32> to vector<4x1xf32>
    %50 = vector.shape_cast %49 : vector<4x1xf32> to vector<4x1x1xf32>
    %51 = tpu.reciprocal %50 {approx = true} : vector<4x1x1xf32> -> vector<4x1x1xf32>
    %52 = vector.broadcast %51 : vector<4x1x1xf32> to vector<4x16x1xf32>
    %53 = arith.mulf %48, %52 : vector<4x16x1xf32>
    %54 = vector.broadcast %53 : vector<4x16x1xf32> to vector<4x16x128xf32>
    %55 = arith.mulf %54, %0 : vector<4x16x128xf32>
    %cst_17 = arith.constant dense<0.000000e+00> : vector<4x128xf32>
    %56 = vector.multi_reduction <add>, %55, %cst_17 [1] : vector<4x16x128xf32> to vector<4x128xf32>
    %57 = vector.shape_cast %56 : vector<4x128xf32> to vector<4x1x128xf32>
    %c0_18 = arith.constant 0 : index
    %c0_19 = arith.constant 0 : index
    %c0_20 = arith.constant 0 : index
    %58 = vector.load %arg4[%c0_18, %c0_19, %c0_20] : memref<4x16x512xf32, #tpu.memory_space<vmem>>, vector<4x16x128xf32>
    tpu.vector_store %arg4[%c0_18, %c0_19, %c0_20], %0 {strides = array<i32>} : memref<4x16x512xf32, #tpu.memory_space<vmem>>, vector<4x16x128xf32>,
    %c0_21 = arith.constant 0 : index
    %c0_22 = arith.constant 0 : index
    %c128 = arith.constant 128 : index
    %59 = vector.load %arg4[%c0_21, %c0_22, %c128] : memref<4x16x512xf32, #tpu.memory_space<vmem>>, vector<4x16x128xf32>
    tpu.vector_store %arg4[%c0_21, %c0_22, %c128], %43 {strides = array<i32>} : memref<4x16x512xf32, #tpu.memory_space<vmem>>, vector<4x16x128xf32>,
    %60 = arith.mulf %0, %43 : vector<4x16x128xf32>
    %c0_23 = arith.constant 0 : index
    %c0_24 = arith.constant 0 : index
    %c256 = arith.constant 256 : index
    %61 = vector.load %arg4[%c0_23, %c0_24, %c256] : memref<4x16x512xf32, #tpu.memory_space<vmem>>, vector<4x16x128xf32>
    tpu.vector_store %arg4[%c0_23, %c0_24, %c256], %60 {strides = array<i32>} : memref<4x16x512xf32, #tpu.memory_space<vmem>>, vector<4x16x128xf32>,
    %62 = vector.broadcast %57 : vector<4x1x128xf32> to vector<4x16x128xf32>
    %63 = arith.mulf %0, %62 : vector<4x16x128xf32>
    %c0_25 = arith.constant 0 : index
    %c0_26 = arith.constant 0 : index
    %c384 = arith.constant 384 : index
    %64 = vector.load %arg4[%c0_25, %c0_26, %c384] : memref<4x16x512xf32, #tpu.memory_space<vmem>>, vector<4x16x128xf32>
    tpu.vector_store %arg4[%c0_25, %c0_26, %c384], %63 {strides = array<i32>} : memref<4x16x512xf32, #tpu.memory_space<vmem>>, vector<4x16x128xf32>,
    return
  }
  func.func @transform_0(%arg0: i32) -> (i32, i32, i32) {
    %c0_i32 = arith.constant 0 : i32
    %c0_i32_0 = arith.constant 0 : i32
    %c0_i32_1 = arith.constant 0 : i32
    return %arg0, %c0_i32, %c0_i32_0 : i32, i32, i32
  }
  func.func @transform_1(%arg0: i32) -> (i32, i32, i32) {
    %c0_i32 = arith.constant 0 : i32
    %c0_i32_0 = arith.constant 0 : i32
    %c0_i32_1 = arith.constant 0 : i32
    return %arg0, %c0_i32, %c0_i32_0 : i32, i32, i32
  }
  func.func @transform_2(%arg0: i32) -> (i32, i32) {
    %c0_i32 = arith.constant 0 : i32
    %c0_i32_0 = arith.constant 0 : i32
    %c0_i32_1 = arith.constant 0 : i32
    return %c0_i32, %c0_i32_0 : i32, i32
  }
  func.func @transform_3(%arg0: i32) -> (i32, i32, i32) {
    %c0_i32 = arith.constant 0 : i32
    %c0_i32_0 = arith.constant 0 : i32
    %c0_i32_1 = arith.constant 0 : i32
    return %arg0, %c0_i32, %c0_i32_0 : i32, i32, i32
  }
}

</mosaic_0001>

<bundles_post_ra>
// kernel: tpu_custom_call.1
= control target key start
LH: loop header
LB: loop body
LE: loop exit
PB: predicated region body
PF: predicated region fallthrough
CT: control target
= control target key end

     0   :  { %8 = vsyncpa [#allocation3], 0  ;;  %s3420_s0 = inlined_call_operand.hbm [shape: f32[8,16,128], index: 0, kind: input, shape index: {}]   ;;  %s3421_s1 = inlined_call_operand.hbm [shape: f32[8,128,128], index: 1, kind: input, shape index: {}]   ;;  %s3422_s2 = inlined_call_operand.vmem [shape: f32[3,128], index: 2, kind: input, shape index: {}]   ;;  %s3423_s3 = inlined_call_operand.hbm [shape: f32[8,16,512], index: 3, kind: output, shape index: {}]  }
   0x1   :  { %10 = vsyncpa [#allocation3 + $0x1], 0 }
   0x2   :  { %11 = vsyncpa [#allocation6], 0 }
   0x3   :  { %13 = vsyncpa [#allocation6 + $0x1], 0 }
   0x4   :  { %14 = vsyncpa [#allocation4], 0 }
   0x5   :  { %16 = vsyncpa [#allocation4 + $0x1], 0  ;;  %s2282_s12 = smov 0   ;;  %s2284_s13 = smov 0  }
   0x6   :  { %s2286_s14 = smov 0   ;;  %s2288_s15 = smov 0  }
   0x7 LB: > { %s2303_s16 = sadd.s32 4294967295, %s2251_s15   ;;  %s1738_s17 = sadd.s32 4294967294, %s2251_s15   ;;  %s2251_s15 = sphi %s2288_s15, %s3463_s15   ;;  %s2247_s14 = sphi %s2286_s14, %s3462_s14   ;;  %s2243_s13 = sphi %s2284_s13, %s3461_s13   ;;  %s2239_s12 = sphi %s2282_s12, %s3460_s12  }
   0x8   : > { %s2307_s18 = sadd.s32 1, %s2251_s15   ;;  %s29_s19 = sadd.s32 1, %s2247_s14 }
   0x9   : > { %s26_s20 = ssub.s32 %s2251_s15, %s2307_s18  ;;  %p36_p0 = scmp.ne.s32.totalorder %s2247_s14, %s2243_s13 }
   0xa   : > { %p27_p1 = scmp.eq.s32.totalorder %s26_s20, 0  ;;  %p37_p2 = scmp.eq.s32.totalorder %s2251_s15, 0 }
   0xb   : > { %p42_p3 = scmp.ne.s32.totalorder %s2243_s13, %s2239_s12  ;;  %p43_p4 = scmp.eq.s32.totalorder %s2303_s16, 0 }
   0xc   : > { %s2319_s21 = scalar_select %p27_p1, %s2247_s14, %s29_s19  }
   0xd   : > { %p2321_p5 = por %p37_p2, %p36_p0  ;;  %p2325_p6 = por %p43_p4, %p42_p3 }
   0xe   : > { %p113_p7 = scmp.eq.s32.totalorder %s2303_s16, 1  ;;  %p119_p8 = scmp.eq.s32.totalorder %s1738_s17, 1 }
   0xf   : > { %s3437_s23 = scalar_select %p2325_p6, 1, 0 }
  0x10   : > { %p2017_p10 = scmp.lt.s32.totalorder %s2251_s15, 2  ;;  %p2332_p11 = por %p113_p7, %p36_p0 }
  0x11   : > { %p2336_p12 = por %p119_p8, %p42_p3  ;;  %s2341_s26 = sand.u32 1, %s2247_s14  }
  0x12   : > { %s3438_s24 = scalar_select %p2332_p11, 1, 0 }
  0x13   : > { %s3439_s25 = scalar_select %p2336_p12, 1, 0 }
  0x14   : > { %s1763_s27 = sshll.u32 %s2251_s15, 10  ;;  %s1741_s28 = sshll.u32 %s2341_s26, 6 }
  0x15   : > { %s2348_s4 = scalar_lea.hbm %s3420_s0, %s1763_s27  ;;  %s146_s5 = scalar_lea.vmem [#allocation2], %s1741_s28 }
  0x16   : > { %s154_s6 = sshll.u32 %s146_s5, 4  ;;  %p2352_p13 = pnand %p2017_p10, %p2321_p5  ;;  %s2356_s6 = int_to_ptr.vmem [resolvable:$true] %s154_s6 }
  0x17   : > { %s143_s8 = scalar_lea.sflag [#allocation3], %s2341_s26  ;;  %s2121_s9 = scalar_lea.hbm %s2348_s4, 1024 }
  0x18   : > { %p2122_p0 = scmp.ne.s32.totalorder %s2348_s4, %s2121_s9  ;;  %p2123_p1 = pneg %p2352_p13 }
  0x19   : > { %s2126_s17 = scalar_lea.hbm %s3420_s0, 2048  ;;  %p2127_p4 = scmp.lt.u32.totalorder %s2348_s4, %s3420_s0 }
  0x1a   : > { %p2124_p2 = pnand %p2123_p1, %p2122_p0  ;;  %p2128_p5 = scmp.lt.u32.totalorder %s2126_s17, %s2121_s9 }
  0x1b   : > { %p2130_p8 = scmp.lt.u32.totalorder %s2121_s9, %s2348_s4 }
  0x1c   : > { %p2125_p3 = pneg %p2124_p2  ;;  %p2129_p7 = por %p2128_p5, %p2127_p4 }
  0x1e   : > { %p2131_p10 = por %p2130_p8, %p2129_p7 }
  0x20   : > { %p2132_p9 = pnand %p2131_p10, %p2125_p3 }
  0x22   : > { %2135 = shalt.err (!%p2132_p9)
}
  0x23   : > { %s2136_s22 = scalar_lea.vmem %s2356_s6, 1024  ;;  %s2253_s27 = smov [#allocation2]  }
  0x24   : > { %p2137_p0 = scmp.ne.s32.totalorder %s2356_s6, %s2136_s22  ;;  %s2141_s28 = sshll.u32 %s2253_s27, 4  ;;  %s2142_s28 = int_to_ptr.vmem [resolvable:$false] %s2141_s28 }
  0x25   : > { %s2143_s29 = scalar_lea.vmem %s2142_s28, 2048  ;;  %p2144_p11 = scmp.lt.s32.totalorder %s2356_s6, %s2142_s28 }
  0x26   : > { %p2139_p2 = pnand %p2137_p0, %p2123_p1  ;;  %p2145_p4 = scmp.lt.s32.totalorder %s2143_s29, %s2136_s22 }
  0x28   : > { %p2140_p12 = pneg %p2139_p2  ;;  %p2146_p5 = por %p2145_p4, %p2144_p11 }
  0x2a   : > { %p2147_p7 = pnand %p2146_p5, %p2140_p12 }
  0x2c   : > { %2150 = shalt.err (!%p2147_p7)
}
  0x2d   : > { %s2254_s30 = smov 128   ;;  %s2255_s5 = smov 8  }
  0x2e   : > { %2009 = dma.hbm_to_vmem [thread:$0]  (!%p2352_p13), %s2348_s4, 1024, %s2356_s6, %s143_s8, %s2254_s30, %s2254_s30, %s2255_s5  }
  0x2f   : > { %p1749_p9 = scmp.ge.s32.totalorder %s2251_s15, 1  ;;  %p184_p11 = scmp.lt.s32.totalorder %s2251_s15, 3 }
  0x30   : > { %s1745_s9 = sshll.u32 %s2341_s26, 9  ;;  %s1765_s11 = sshll.u32 %s2251_s15, 13 }
  0x31   : > { %p2392_p12 = pnand %p1749_p9, %p184_p11  ;;  %s168_s17 = scalar_lea.vmem [#allocation5], %s1745_s9 }
  0x32   : > { %s176_s19 = sshll.u32 %s168_s17, 4  ;;  %s2400_s27 = scalar_lea.hbm %s3421_s1, %s1765_s11  ;;  %s2402_s19 = int_to_ptr.vmem [resolvable:$true] %s176_s19 }
  0x33   : > { %s165_s4 = scalar_lea.sflag [#allocation6], %s2341_s26  ;;  %s2151_s6 = scalar_lea.hbm %s2400_s27, 8192 }
  0x34   : > { %p2152_p3 = scmp.ne.s32.totalorder %s2400_s27, %s2151_s6  ;;  %s2156_s29 = scalar_lea.hbm %s3421_s1, 16384 }
  0x35   : > { %p2157_p0 = scmp.lt.u32.totalorder %s2400_s27, %s3421_s1  ;;  %p2158_p2 = scmp.lt.u32.totalorder %s2156_s29, %s2151_s6 }
  0x36   : > { %p2154_p8 = pnand %p2152_p3, %p2123_p1  ;;  %p2160_p5 = scmp.lt.u32.totalorder %s2151_s6, %s2400_s27 }
  0x37   : > { %p2159_p4 = por %p2158_p2, %p2157_p0 }
  0x38   : > { %p2155_p10 = pneg %p2154_p8 }
  0x39   : > { %p2161_p7 = por %p2160_p5, %p2159_p4 }
  0x3b   : > { %p2162_p9 = pnand %p2161_p7, %p2155_p10 }
  0x3d   : > { %2165 = shalt.err (!%p2162_p9)
}
  0x3e   : > { %s2166_s17 = scalar_lea.vmem %s2402_s19, 8192  ;;  %s2256_s20 = smov [#allocation5]  }
  0x3f   : > { %p2167_p11 = scmp.ne.s32.totalorder %s2402_s19, %s2166_s17  ;;  %s2171_s22 = sshll.u32 %s2256_s20, 4  ;;  %s2172_s22 = int_to_ptr.vmem [resolvable:$false] %s2171_s22 }
  0x40   : > { %s2173_s8 = scalar_lea.vmem %s2172_s22, 16384  ;;  %p2174_p6 = scmp.lt.s32.totalorder %s2402_s19, %s2172_s22 }
  0x41   : > { %p2169_p3 = pnand %p2167_p11, %p2123_p1  ;;  %p2175_p0 = scmp.lt.s32.totalorder %s2173_s8, %s2166_s17 }
  0x43   : > { %p2170_p8 = pneg %p2169_p3  ;;  %p2176_p2 = por %p2175_p0, %p2174_p6 }
  0x45   : > { %p2177_p4 = pnand %p2176_p2, %p2170_p8 }
  0x47   : > { %2180 = shalt.err (!%p2177_p4)
}
  0x48   : > { %2012 = dma.hbm_to_vmem [thread:$0]  (!%p2352_p13), %s2400_s27, 8192, %s2402_s19, %s165_s4, %s2254_s30, %s2254_s30, %s2255_s5  }
  0x49   : > { %188 = sbr.rel (%p2392_p12) target bundleno = 985 (0x3d9), region = 32 }
  0x50   : > { %s2436_s6 = sand.u32 1, %s2243_s13   ;;  %p3442_p6 = scmp.ne.s32.totalorder %s3437_s23, 0 }
  0x51   : > { %s1750_s28 = sshll.u32 %s2436_s6, 6  ;;  %s191_s29 = scalar_lea.sflag [#allocation3], %s2436_s6 }
  0x52   : > { %s2440_s7 = scalar_lea.vmem [#allocation2], %s1750_s28 }
  0x53   : > { %2226 = dma.done.wait (%p3442_p6), %s191_s29, 1024  }
  0x54   : > { %2228 = vsyncadd (%p3442_p6), %s191_s29, 4294966272  ;;  %s1751_s26 = sshll.u32 %s2436_s6, 9  ;;  %s200_s30 = scalar_lea.sflag [#allocation6], %s2436_s6 }
  0x55   : > { %s2448_s5 = scalar_lea.vmem [#allocation5], %s1751_s26 }
  0x56   : > { %2230 = dma.done.wait (%p3442_p6), %s200_s30, 8192  }
  0x57   : > { %2232 = vsyncadd (%p3442_p6), %s200_s30, 4294959104  ;;  %v3426_v0 = vmov 0.0   ;;  %vm3432_vm0 = vmmov 0   ;;  %v243_v1 = vld [vmem:[%s2448_s5] sm:$0xff]  ;;  %v244_v2 = vld [vmem:[%s2448_s5 + $0x8] sm:$0xff]  ;;  %s1752_s19 = sshll.u32 %s2436_s6, 8 }
  0x58   : > { %1840 = vmatprep.subr.bf16.mxu0 %v3426_v0  ;;  %1860 = vmatprep.subr.bf16.mxu1 %v3426_v0  ;;  %v259_v3 = vld [vmem:[%s2448_s5 + $0x80] sm:$0xff]  ;;  %v2463_v4 = vpack.c.bf16 %v244_v2, %v243_v1  ;;  %v260_v5 = vld [vmem:[%s2448_s5 + $0x88] sm:$0xff]  ;;  %v245_v7 = vld [vmem:[%s2448_s5 + $0x10] sm:$0xff]  ;;  %s2502_s27 = scalar_lea.vmem [#allocation7], %s1752_s19  ;;  %vm821_vm1 = vcmask 130112   ;;  %vm828_vm2 = vcmask 195712  }
  0x59   : > { %1856 = vmatprep.mubr.msk.bf16.mxu0 %vm3432_vm0, %v3426_v0  ;;  %1876 = vmatprep.mubr.msk.bf16.mxu1 %vm3432_vm0, %v3426_v0  ;;  %v2466_v6 = vpack.c.bf16 %v260_v5, %v259_v3  ;;  %v246_v8 = vld [vmem:[%s2448_s5 + $0x18] sm:$0xff]  ;;  %v2476_v9 = vld [vmem:[%s3422_s2 + $0x1] ss:$0 sm:$0xff]  ;;  %v261_v10 = vld [vmem:[%s2448_s5 + $0x90] sm:$0xff]  ;;  %vm835_vm3 = vcmask 261312   ;;  %vm842_vm4 = vcmask 326912  }
  0x5a   : > { %1841 = vmatpush3.bf16.xpose.msra.mxu0 %v2463_v4  ;;  %v262_v11 = vld [vmem:[%s2448_s5 + $0x98] sm:$0xff]  ;;  %v358_v12 = vmul.f32 %v2476_v9, %v259_v3  ;;  %v342_v13 = vmul.f32 %v2476_v9, %v243_v1  ;;  %v2483_v14 = vpack.c.bf16 %v246_v8, %v245_v7  ;;  %v359_v15 = vmul.f32 %v2476_v9, %v260_v5  ;;  %v247_v18 = vld [vmem:[%s2448_s5 + $0x20] sm:$0xff]  ;;  %v2497_v21 = vld [vmem:[%s2440_s7 + $0x8] sm:$0xff]  ;;  %s1767_s20 = sshll.u32 %s2303_s16, 12  ;;  %s1642_s22 = sshll.u32 %s2502_s27, 4  ;;  %s3372_s22 = int_to_ptr.vmem [resolvable:$true] %s1642_s22 }
  0x5b   : > { %1861 = vmatpush3.bf16.xpose.msra.mxu1 %v2466_v6  ;;  %1842 = vmatprep.subr.bf16.mxu0 %v3426_v0  ;;  %v2486_v16 = vpack.c.bf16 %v262_v11, %v261_v10  ;;  %v343_v17 = vmul.f32 %v2476_v9, %v244_v2  ;;  %v360_v19 = vmul.f32 %v2476_v9, %v261_v10  ;;  %v2494_v20 = vld [vmem:[%s2440_s7] sm:$0xff]  ;;  %v248_v22 = vld [vmem:[%s2448_s5 + $0x28] sm:$0xff]  ;;  %v2509_v23 = vld [vmem:[%s2440_s7 + $0x10] sm:$0xff]  ;;  %vm849_vm5 = vcmask 392512   ;;  %s3370_s29 = scalar_lea.hbm %s3423_s3, %s1767_s20  ;;  %s1628_s16 = scalar_lea.sflag [#allocation4], %s2436_s6 }
  0x5c   : > { %1862 = vmatprep.subr.bf16.mxu1 %v3426_v0  ;;  %438 = vadd.xlane.f32.xlu1 %v358_v12  ;;  %1579 = vst [vmem:[%s2502_s27] sm:$0xff] %v2494_v20  ;;  %1580 = vst [vmem:[%s2502_s27 + $0x20] sm:$0xff] %v2497_v21  ;;  %v2512_v24 = vld [vmem:[%s2440_s7 + $0x18] sm:$0xff]  ;;  %v263_v25 = vld [vmem:[%s2448_s5 + $0xa0] sm:$0xff]  ;;  %v344_v27 = vmul.f32 %v2476_v9, %v245_v7  ;;  %v2522_v28 = vpack.c.bf16 %v248_v22, %v247_v18  ;;  %vm856_vm6 = vcmask 458112   ;;  %vm863_vm7 = vcmask 523712   ;;  %p3457_p1 = scmp.ne.s32.totalorder %s3438_s24, 0 }
  0x5d   : > { %406 = vadd.xlane.f32.xlu0 %v342_v13  ;;  %v264_v26 = vld [vmem:[%s2448_s5 + $0xa8] sm:$0xff]  ;;  %1581 = vst [vmem:[%s2502_s27 + $0x40] sm:$0xff] %v2509_v23  ;;  %1582 = vst [vmem:[%s2502_s27 + $0x60] sm:$0xff] %v2512_v24  ;;  %v361_v29 = vmul.f32 %v2476_v9, %v262_v11  ;;  %v345_v31 = vmul.f32 %v2476_v9, %v246_v8  ;;  %v362_v32 = vmul.f32 %v2476_v9, %v263_v25  ;;  %v249_v33 = vld [vmem:[%s2448_s5 + $0x30] sm:$0xff]  ;;  %vm870_vm8 = vcmask 589312   ;;  %s2259_s26 = smov [#allocation7]  }
  0x5e   : > { %v2525_v30 = vpack.c.bf16 %v264_v26, %v263_v25  ;;  %v250_v34 = vld [vmem:[%s2448_s5 + $0x38] sm:$0xff]  ;;  %v265_v35 = vld [vmem:[%s2448_s5 + $0xb0] sm:$0xff]  ;;  %v346_v37 = vmul.f32 %v2476_v9, %v247_v18  ;;  %v363_v39 = vmul.f32 %v2476_v9, %v264_v26  ;;  %v2542_v40 = vld [vmem:[%s2440_s7 + $0x20] sm:$0xff]  ;;  %v347_v45 = vmul.f32 %v2476_v9, %v248_v22  ;;  %s2185_s30 = sshll.u32 %s2259_s26, 4  ;;  %s2186_s30 = int_to_ptr.vmem [resolvable:$false] %s2185_s30 }
  0x5f   : > { %v266_v36 = vld [vmem:[%s2448_s5 + $0xb8] sm:$0xff]  ;;  %v2538_v38 = vpack.c.bf16 %v250_v34, %v249_v33  ;;  %v2547_v42 = vld [vmem:[%s2440_s7 + $0x28] sm:$0xff]  ;;  %1583 = vst [vmem:[%s2502_s27 + $0x80] sm:$0xff] %v2542_v40  ;;  %v2552_v43 = vld [vmem:[%s2440_s7 + $0x30] sm:$0xff]  ;;  %v364_v46 = vmul.f32 %v2476_v9, %v265_v35  ;;  %v348_v51 = vmul.f32 %v2476_v9, %v249_v33  ;;  %v349_v55 = vmul.f32 %v2476_v9, %v250_v34  ;;  %p2188_p5 = scmp.lt.s32.totalorder %s3372_s22, %s2186_s30 }
  0x60   : > { %440 = vadd.xlane.f32.xlu1 %v359_v15  ;;  %v2544_v41 = vpack.c.bf16 %v266_v36, %v265_v35  ;;  %v2555_v44 = vld [vmem:[%s2440_s7 + $0x38] sm:$0xff]  ;;  %1584 = vst [vmem:[%s2502_s27 + $0xa0] sm:$0xff] %v2547_v42  ;;  %1585 = vst [vmem:[%s2502_s27 + $0xc0] sm:$0xff] %v2552_v43  ;;  %v251_v47 = vld [vmem:[%s2448_s5 + $0x40] sm:$0xff]  ;;  %v365_v53 = vmul.f32 %v2476_v9, %v266_v36  ;;  %vm877_vm9 = vcmask 654912   ;;  %vm884_vm10 = vcmask 720512  }
  0x61   : > { %408 = vadd.xlane.f32.xlu0 %v343_v17  ;;  %1586 = vst [vmem:[%s2502_s27 + $0xe0] sm:$0xff] %v2555_v44  ;;  %v252_v48 = vld [vmem:[%s2448_s5 + $0x48] sm:$0xff]  ;;  %v267_v49 = vld [vmem:[%s2448_s5 + $0xc0] sm:$0xff]  ;;  %v253_v57 = vld [vmem:[%s2448_s5 + $0x50] sm:$0xff]  ;;  %v350_v61 = vmul.f32 %v2476_v9, %v251_v47  ;;  %vm891_vm11 = vcmask 786112   ;;  %vm898_vm12 = vcmask 851712  }
  0x62   : > { %1843 = vmatpush3.bf16.xpose.msra.mxu0 %v2483_v14  ;;  %v268_v50 = vld [vmem:[%s2448_s5 + $0xc8] sm:$0xff]  ;;  %v2574_v52 = vpack.c.bf16 %v252_v48, %v251_v47  ;;  %v366_v56 = vmul.f32 %v2476_v9, %v267_v49  ;;  %v254_v58 = vld [vmem:[%s2448_s5 + $0x58] sm:$0xff]  ;;  %v269_v59 = vld [vmem:[%s2448_s5 + $0xd0] sm:$0xff]  ;;  %v351_v2 = vmul.f32 %v2476_v9, %v252_v48  ;;  %v352_v11 = vmul.f32 %v2476_v9, %v253_v57  ;;  %s2181_s7 = scalar_lea.vmem %s3372_s22, 4096 }
  0x63   : > { %1863 = vmatpush3.bf16.xpose.msra.mxu1 %v2486_v16  ;;  %1844 = vmatprep.subr.bf16.mxu0 %v3426_v0  ;;  %v2577_v54 = vpack.c.bf16 %v268_v50, %v267_v49  ;;  %v270_v60 = vld [vmem:[%s2448_s5 + $0xd8] sm:$0xff]  ;;  %v2590_v62 = vpack.c.bf16 %v254_v58, %v253_v57  ;;  %v367_v63 = vmul.f32 %v2476_v9, %v268_v50  ;;  %v255_v5 = vld [vmem:[%s2448_s5 + $0x60] sm:$0xff]  ;;  %v256_v7 = vld [vmem:[%s2448_s5 + $0x68] sm:$0xff]  ;;  %vm905_vm13 = vcmask 917312   ;;  %p2182_p13 = scmp.ne.s32.totalorder %s3372_s22, %s2181_s7 }
  0x64   : > { %1864 = vmatprep.subr.bf16.mxu1 %v3426_v0  ;;  %442 = vadd.xlane.f32.xlu1 %v360_v19  ;;  %v2593_v1 = vpack.c.bf16 %v270_v60, %v269_v59  ;;  %v368_v3 = vmul.f32 %v2476_v9, %v269_v59  ;;  %v271_v8 = vld [vmem:[%s2448_s5 + $0xe0] sm:$0xff]  ;;  %v272_v10 = vld [vmem:[%s2448_s5 + $0xe8] sm:$0xff]  ;;  %v2606_v12 = vpack.c.bf16 %v256_v7, %v255_v5  ;;  %v257_v19 = vld [vmem:[%s2448_s5 + $0x70] sm:$0xff]  ;;  %vm912_vm14 = vcmask 982912  }
  0x65   : > { %410 = vadd.xlane.f32.xlu0 %v344_v27  ;;  %v369_v13 = vmul.f32 %v2476_v9, %v270_v60  ;;  %v2609_v15 = vpack.c.bf16 %v272_v10, %v271_v8  ;;  %v353_v17 = vmul.f32 %v2476_v9, %v254_v58  ;;  %v370_v18 = vmul.f32 %v2476_v9, %v271_v8  ;;  %v258_v22 = vld [vmem:[%s2448_s5 + $0x78] sm:$0xff]  ;;  %v273_v25 = vld [vmem:[%s2448_s5 + $0xf0] sm:$0xff]  ;;  %v276_v47 = vld [vmem:[%s2448_s5 + $0x108] sm:$0xff]  ;;  %p2183_p12 = pnand %p2182_p13, %p3457_p1 }
  0x66   : > { %v274_v26 = vld [vmem:[%s2448_s5 + $0xf8] sm:$0xff]  ;;  %v354_v27 = vmul.f32 %v2476_v9, %v255_v5  ;;  %v355_v34 = vmul.f32 %v2476_v9, %v256_v7  ;;  %v291_v48 = vld [vmem:[%s2448_s5 + $0x180] sm:$0xff]  ;;  %v292_v49 = vld [vmem:[%s2448_s5 + $0x188] sm:$0xff]  ;;  %v356_v50 = vmul.f32 %v2476_v9, %v257_v19  ;;  %v357_v58 = vmul.f32 %v2476_v9, %v258_v22 }
  0x67   : > { %v2630_v33 = vpack.c.bf16 %v274_v26, %v273_v25  ;;  %v373_v57 = vmul.f32 %v2476_v9, %v274_v26  ;;  %v2661_v59 = vld [vmem:[%s3422_s2] ss:$0 sm:$0xff]  ;;  %v277_v60 = vld [vmem:[%s2448_s5 + $0x110] sm:$0xff]  ;;  %vm919_vm15 = vcmask 1048512   ;;  %p2184_p10 = pneg %p2183_p12 }
  0x68   : > { %444 = vadd.xlane.f32.xlu1 %v361_v29  ;;  %v2622_v29 = vpack.c.bf16 %v258_v22, %v257_v19  ;;  %v314_v5 = vmul.f32 %v2661_v59, %v2494_v20  ;;  %v391_v22 = vmul.f32 %v2476_v9, %v292_v49  ;;  %v281_v26 = vld [vmem:[%s2448_s5 + $0x130] sm:$0xff] }
  0x69   : > { %412 = vadd.xlane.f32.xlu0 %v345_v31  ;;  %v2627_v31 = vld [vmem:[%s3422_s2 + $0x2] ss:$0 sm:$0xff] }
  0x6a   : > { %1845 = vmatpush3.bf16.xpose.msra.mxu0 %v2522_v28  ;;  %v538_v35 = vmul.f32 %v2627_v31, %v2494_v20  ;;  %v539_v36 = vmul.f32 %v2627_v31, %v2497_v21  ;;  %v279_v20 = vld [vmem:[%s2448_s5 + $0x120] sm:$0xff] }
  0x6b   : > { %1865 = vmatpush3.bf16.xpose.msra.mxu1 %v2525_v30  ;;  %1846 = vmatprep.subr.bf16.mxu0 %v3426_v0 }
  0x6c   : > { %1866 = vmatprep.subr.bf16.mxu1 %v3426_v0  ;;  %446 = vadd.xlane.f32.xlu1 %v362_v32  ;;  %v371_v32 = vmul.f32 %v2476_v9, %v272_v10  ;;  %v316_v10 = vmul.f32 %v2661_v59, %v2509_v23 }
  0x6d   : > { %414 = vadd.xlane.f32.xlu0 %v346_v37  ;;  %v540_v37 = vmul.f32 %v2627_v31, %v2509_v23 }
  0x70   : > { %448 = vadd.xlane.f32.xlu1 %v363_v39  ;;  %v541_v39 = vmul.f32 %v2627_v31, %v2512_v24 }
  0x71   : > { %416 = vadd.xlane.f32.xlu0 %v347_v45  ;;  %v372_v45 = vmul.f32 %v2476_v9, %v273_v25  ;;  %v390_v25 = vmul.f32 %v2476_v9, %v291_v48 }
  0x72   : > { %1847 = vmatpush3.bf16.xpose.msra.mxu0 %v2538_v38 }
  0x73   : > { %1867 = vmatpush3.bf16.xpose.msra.mxu1 %v2544_v41  ;;  %1848 = vmatprep.subr.bf16.mxu0 %v3426_v0 }
  0x74   : > { %1868 = vmatprep.subr.bf16.mxu1 %v3426_v0  ;;  %450 = vadd.xlane.f32.xlu1 %v364_v46  ;;  %v275_v46 = vld [vmem:[%s2448_s5 + $0x100] sm:$0xff] }
  0x75   : > { %418 = vadd.xlane.f32.xlu0 %v348_v51  ;;  %v546_v51 = vpack.c.bf16 %v539_v36, %v538_v35  ;;  %v374_v23 = vmul.f32 %v2476_v9, %v275_v46  ;;  %v376_v36 = vmul.f32 %v2476_v9, %v277_v60 }
  0x78   : > { %452 = vadd.xlane.f32.xlu1 %v365_v53  ;;  %v547_v53 = vpack.c.bf16 %v541_v39, %v540_v37 }
  0x79   : > { %420 = vadd.xlane.f32.xlu0 %v349_v55  ;;  %v2651_v55 = vpack.c.bf16 %v276_v47, %v275_v46 }
  0x7a   : > { %1849 = vmatpush3.bf16.xpose.msra.mxu0 %v2574_v52 }
  0x7b   : > { %1869 = vmatpush3.bf16.xpose.msra.mxu1 %v2577_v54  ;;  %1850 = vmatprep.subr.bf16.mxu0 %v3426_v0 }
  0x7c   : > { %1870 = vmatprep.subr.bf16.mxu1 %v3426_v0  ;;  %454 = vadd.xlane.f32.xlu1 %v366_v56  ;;  %v2653_v56 = vpack.c.bf16 %v292_v49, %v291_v48  ;;  %v284_v48 = vld [vmem:[%s2448_s5 + $0x148] sm:$0xff]  ;;  %v299_v49 = vld [vmem:[%s2448_s5 + $0x1c0] sm:$0xff] }
  0x7d   : > { %422 = vadd.xlane.f32.xlu0 %v350_v61  ;;  %v278_v61 = vld [vmem:[%s2448_s5 + $0x118] sm:$0xff] }
  0x7e   : > { %v2676_v7 = vpack.c.bf16 %v278_v61, %v277_v60  ;;  %v377_v46 = vmul.f32 %v2476_v9, %v278_v61 }
  0x80   : > { %456 = vadd.xlane.f32.xlu1 %v367_v63  ;;  %v293_v63 = vld [vmem:[%s2448_s5 + $0x190] sm:$0xff] }
  0x81   : > { %424 = vadd.xlane.f32.xlu0 %v351_v2  ;;  %v294_v2 = vld [vmem:[%s2448_s5 + $0x198] sm:$0xff]  ;;  %v392_v35 = vmul.f32 %v2476_v9, %v293_v63 }
  0x82   : > { %1851 = vmatpush3.bf16.xpose.msra.mxu0 %v2590_v62  ;;  %v2680_v8 = vpack.c.bf16 %v294_v2, %v293_v63  ;;  %v285_v63 = vld [vmem:[%s2448_s5 + $0x150] sm:$0xff] }
  0x83   : > { %1871 = vmatpush3.bf16.xpose.msra.mxu1 %v2593_v1  ;;  %1852 = vmatprep.subr.bf16.mxu0 %v3426_v0 }
  0x84   : > { %1872 = vmatprep.subr.bf16.mxu1 %v3426_v0  ;;  %458 = vadd.xlane.f32.xlu1 %v368_v3  ;;  %v315_v3 = vmul.f32 %v2661_v59, %v2497_v21  ;;  %v317_v21 = vmul.f32 %v2661_v59, %v2512_v24  ;;  %v375_v24 = vmul.f32 %v2476_v9, %v276_v47  ;;  %v283_v47 = vld [vmem:[%s2448_s5 + $0x140] sm:$0xff] }
  0x85   : > { %426 = vadd.xlane.f32.xlu0 %v352_v11  ;;  %v280_v11 = vld [vmem:[%s2448_s5 + $0x128] sm:$0xff] }
  0x86   : > { %v379_v61 = vmul.f32 %v2476_v9, %v280_v11 }
  0x88   : > { %460 = vadd.xlane.f32.xlu1 %v369_v13  ;;  %v295_v13 = vld [vmem:[%s2448_s5 + $0x1a0] sm:$0xff] }
  0x89   : > { %428 = vadd.xlane.f32.xlu0 %v353_v17  ;;  %v296_v17 = vld [vmem:[%s2448_s5 + $0x1a8] sm:$0xff] }
  0x8a   : > { %1853 = vmatpush3.bf16.xpose.msra.mxu0 %v2606_v12  ;;  %v2698_v19 = vpack.c.bf16 %v296_v17, %v295_v13  ;;  %v395_v60 = vmul.f32 %v2476_v9, %v296_v17 }
  0x8b   : > { %1873 = vmatpush3.bf16.xpose.msra.mxu1 %v2609_v15  ;;  %1854 = vmatprep.subr.bf16.mxu0 %v3426_v0 }
  0x8c   : > { %1874 = vmatprep.subr.bf16.mxu1 %v3426_v0  ;;  %462 = vadd.xlane.f32.xlu1 %v370_v18  ;;  %v2696_v18 = vpack.c.bf16 %v280_v11, %v279_v20 }
  0x8d   : > { %430 = vadd.xlane.f32.xlu0 %v354_v27  ;;  %v282_v27 = vld [vmem:[%s2448_s5 + $0x138] sm:$0xff] }
  0x8e   : > { %v2712_v37 = vpack.c.bf16 %v282_v27, %v281_v26  ;;  %v381_v17 = vmul.f32 %v2476_v9, %v282_v27  ;;  %v382_v27 = vmul.f32 %v2476_v9, %v283_v47 }
  0x90   : > { %464 = vadd.xlane.f32.xlu1 %v371_v32  ;;  %v297_v32 = vld [vmem:[%s2448_s5 + $0x1b0] sm:$0xff] }
  0x91   : > { %432 = vadd.xlane.f32.xlu0 %v355_v34  ;;  %v298_v34 = vld [vmem:[%s2448_s5 + $0x1b8] sm:$0xff] }
  0x92   : > { %1855 = vmatpush3.bf16.xpose.msra.mxu0 %v2622_v29  ;;  %v2714_v39 = vpack.c.bf16 %v298_v34, %v297_v32 }
  0x93   : > { %1875 = vmatpush3.bf16.xpose.msra.mxu1 %v2630_v33  ;;  %1880 = vmatprep.subr.bf16.mxu0 %v3426_v0 }
  0x94   : > { %1900 = vmatprep.subr.bf16.mxu1 %v3426_v0  ;;  %466 = vadd.xlane.f32.xlu1 %v372_v45  ;;  %v393_v45 = vmul.f32 %v2476_v9, %v294_v2  ;;  %v286_v2 = vld [vmem:[%s2448_s5 + $0x158] sm:$0xff] }
  0x95   : > { %434 = vadd.xlane.f32.xlu0 %v356_v50  ;;  %v300_v50 = vld [vmem:[%s2448_s5 + $0x1c8] sm:$0xff] }
  0x98   : > { %468 = vadd.xlane.f32.xlu1 %v373_v57  ;;  %v2728_v57 = vpack.c.bf16 %v284_v48, %v283_v47  ;;  %v305_v47 = vld [vmem:[%s2448_s5 + $0x1f0] sm:$0xff] }
  0x99   : > { %1857 = vmatmul.mubr.bf16.vlgmr.msra.gmra.mrb[0].mxu0 %v546_v51  ;;  %436 = vadd.xlane.f32.xlu0 %v357_v58  ;;  %v394_v51 = vmul.f32 %v2476_v9, %v295_v13  ;;  %v2730_v58 = vpack.c.bf16 %v300_v50, %v299_v49  ;;  %v397_v13 = vmul.f32 %v2476_v9, %v298_v34 }
  0x9a   : > { %1877 = vmatmul.mubr.bf16.vlgmr.msra.gmra.mrb[0].mxu1 %v547_v53  ;;  %1881 = vmatpush3.bf16.xpose.msra.mxu0 %v2651_v55  ;;  %v378_v53 = vmul.f32 %v2476_v9, %v279_v20  ;;  %v2744_v20 = vpack.c.bf16 %v286_v2, %v285_v63 }
  0x9b   : > { %1901 = vmatpush3.bf16.xpose.msra.mxu1 %v2653_v56  ;;  %1882 = vmatprep.subr.bf16.mxu0 %v3426_v0  ;;  %3443 = vst [vmem:[#allocation11_spill] sm:$0xff] %v2730_v58 }
  0x9c   : > { %1902 = vmatprep.subr.bf16.mxu1 %v3426_v0  ;;  %1896 = vmatprep.mubr.msk.bf16.mxu0 %vm3432_vm0, %v3426_v0 }
  0x9d   : > { %1916 = vmatprep.mubr.msk.bf16.mxu1 %vm3432_vm0, %v3426_v0  ;;  %324 = vadd.xlane.f32.xlu1 %v315_v3  ;;  %v301_v3 = vld [vmem:[%s2448_s5 + $0x1d0] sm:$0xff] }
  0x9e   : > { %322 = vadd.xlane.f32.xlu0 %v314_v5  ;;  %v302_v5 = vld [vmem:[%s2448_s5 + $0x1d8] sm:$0xff] }
  0x9f   : > { %v2746_v11 = vpack.c.bf16 %v302_v5, %v301_v3 }
  0xa1   : > { %328 = vadd.xlane.f32.xlu1 %v317_v21  ;;  %v396_v21 = vmul.f32 %v2476_v9, %v297_v32  ;;  %3444 = vst [vmem:[#allocation12_spill] sm:$0xff] %v2746_v11 }
  0xa2   : > { %1883 = vmatpush3.bf16.xpose.msra.mxu0 %v2676_v7  ;;  %326 = vadd.xlane.f32.xlu0 %v316_v10  ;;  %v380_v10 = vmul.f32 %v2476_v9, %v281_v26  ;;  %v398_v26 = vmul.f32 %v2476_v9, %v299_v49  ;;  %v306_v49 = vld [vmem:[%s2448_s5 + $0x1f8] sm:$0xff] }
  0xa3   : > { %1903 = vmatpush3.bf16.xpose.msra.mxu1 %v2680_v8  ;;  %1884 = vmatprep.subr.bf16.mxu0 %v3426_v0 }
  0xa4   : > { %1904 = vmatprep.subr.bf16.mxu1 %v3426_v0 }
  0xa5   : > { %472 = vadd.xlane.f32.xlu1 %v375_v24  ;;  %v287_v24 = vld [vmem:[%s2448_s5 + $0x160] sm:$0xff] }
  0xa6   : > { %470 = vadd.xlane.f32.xlu0 %v374_v23  ;;  %v288_v23 = vld [vmem:[%s2448_s5 + $0x168] sm:$0xff] }
  0xa7   : > { %v2760_v32 = vpack.c.bf16 %v288_v23, %v287_v24 }
  0xa9   : > { %504 = vadd.xlane.f32.xlu1 %v391_v22  ;;  %v303_v22 = vld [vmem:[%s2448_s5 + $0x1e0] sm:$0xff]  ;;  %3445 = vst [vmem:[#allocation13_spill] sm:$0xff] %v2760_v32 }
  0xaa   : > { %1885 = vmatpush3.bf16.xpose.msra.mxu0 %v2696_v18  ;;  %502 = vadd.xlane.f32.xlu0 %v390_v25  ;;  %v304_v25 = vld [vmem:[%s2448_s5 + $0x1e8] sm:$0xff] }
  0xab   : > { %1905 = vmatpush3.bf16.xpose.msra.mxu1 %v2698_v19  ;;  %1886 = vmatprep.subr.bf16.mxu0 %v3426_v0  ;;  %v2762_v34 = vpack.c.bf16 %v304_v25, %v303_v22 }
  0xac   : > { %1906 = vmatprep.subr.bf16.mxu1 %v3426_v0 }
  0xad   : > { %506 = vadd.xlane.f32.xlu1 %v392_v35  ;;  %3446 = vst [vmem:[#allocation14_spill] sm:$0xff] %v2762_v34  ;;  %v399_v35 = vmul.f32 %v2476_v9, %v300_v50  ;;  %v384_v50 = vmul.f32 %v2476_v9, %v285_v63  ;;  %v544_v63 = vmul.f32 %v2627_v31, %v2552_v43 }
  0xae   : > { %474 = vadd.xlane.f32.xlu0 %v376_v36  ;;  %v383_v36 = vmul.f32 %v2476_v9, %v284_v48  ;;  %v2778_v48 = vpack.c.bf16 %v306_v49, %v305_v47 }
  0xb0   : > { %3448 = vst [vmem:[#allocation16_spill] sm:$0xff] %v2778_v48 }
  0xb1   : > { %508 = vadd.xlane.f32.xlu1 %v393_v45  ;;  %v289_v45 = vld [vmem:[%s2448_s5 + $0x170] sm:$0xff] }
  0xb2   : > { %1887 = vmatpush3.bf16.xpose.msra.mxu0 %v2712_v37  ;;  %476 = vadd.xlane.f32.xlu0 %v377_v46  ;;  %v290_v46 = vld [vmem:[%s2448_s5 + $0x178] sm:$0xff]  ;;  %s2187_s5 = scalar_lea.vmem %s2186_s30, 8192 }
  0xb3   : > { %1907 = vmatpush3.bf16.xpose.msra.mxu1 %v2714_v39  ;;  %1888 = vmatprep.subr.bf16.mxu0 %v3426_v0  ;;  %p2189_p7 = scmp.lt.s32.totalorder %s2187_s5, %s2181_s7 }
  0xb4   : > { %1908 = vmatprep.subr.bf16.mxu1 %v3426_v0 }
  0xb5   : > { %510 = vadd.xlane.f32.xlu1 %v394_v51  ;;  %v400_v51 = vmul.f32 %v2476_v9, %v301_v3  ;;  %v545_v3 = vmul.f32 %v2627_v31, %v2555_v44  ;;  %p2190_p9 = por %p2189_p7, %p2188_p5 }
  0xb6   : > { %478 = vadd.xlane.f32.xlu0 %v378_v53  ;;  %v2776_v53 = vpack.c.bf16 %v290_v46, %v289_v45 }
  0xb7   : > { %p2191_p11 = pnand %p2190_p9, %p2184_p10 }
  0xb8   : > { %3447 = vst [vmem:[#allocation15_spill] sm:$0xff] %v2776_v53 }
  0xb9   : > { %512 = vadd.xlane.f32.xlu1 %v395_v60  ;;  %v401_v60 = vmul.f32 %v2476_v9, %v302_v5  ;;  %v402_v5 = vmul.f32 %v2476_v9, %v303_v22  ;;  %v404_v22 = vmul.f32 %v2476_v9, %v305_v47 }
  0xba   : > { %1889 = vmatpush3.bf16.xpose.msra.mxu0 %v2728_v57  ;;  %480 = vadd.xlane.f32.xlu0 %v379_v61  ;;  %v542_v61 = vmul.f32 %v2627_v31, %v2542_v40 }
  0xbb   : > { %1909 = vmatpush3.bf16.xpose.msra.mxu1 %v2730_v58  ;;  %1890 = vmatprep.subr.bf16.mxu0 %v3426_v0 }
  0xbc   : > { %1910 = vmatprep.subr.bf16.mxu1 %v3426_v0 }
  0xbd   : > { %514 = vadd.xlane.f32.xlu1 %v396_v21  ;;  %v543_v21 = vmul.f32 %v2627_v31, %v2547_v42  ;;  %v387_v31 = vmul.f32 %v2476_v9, %v288_v23 }
  0xbe   : > { %482 = vadd.xlane.f32.xlu0 %v380_v10  ;;  %v385_v10 = vmul.f32 %v2476_v9, %v286_v2  ;;  %v386_v2 = vmul.f32 %v2476_v9, %v287_v24  ;;  %v388_v24 = vmul.f32 %v2476_v9, %v289_v45 }
  0xc1   : > { %516 = vadd.xlane.f32.xlu1 %v397_v13  ;;  %v548_v13 = vpack.c.bf16 %v543_v21, %v542_v61  ;;  %v810_v21 = vlaneseq }
  0xc2   : > { %1891 = vmatpush3.bf16.xpose.msra.mxu0 %v2744_v20  ;;  %484 = vadd.xlane.f32.xlu0 %v381_v17  ;;  %v549_v17 = vpack.c.bf16 %v545_v3, %v544_v63 }
  0xc3   : > { %1911 = vmatpush3.bf16.xpose.msra.mxu1 %v2746_v11  ;;  %1892 = vmatprep.subr.bf16.mxu0 %v3426_v0  ;;  %v2902_v63 = vand.u32 127, %v810_v21 }
  0xc4   : > { %1912 = vmatprep.subr.bf16.mxu1 %v3426_v0 }
  0xc5   : > { %518 = vadd.xlane.f32.xlu1 %v398_v26  ;;  %v403_v26 = vmul.f32 %v2476_v9, %v304_v25 }
  0xc6   : > { %486 = vadd.xlane.f32.xlu0 %v382_v27 }
  0xc9   : > { %520 = vadd.xlane.f32.xlu1 %v399_v35 }
  0xca   : > { %1893 = vmatpush3.bf16.xpose.msra.mxu0 %v2760_v32  ;;  %488 = vadd.xlane.f32.xlu0 %v383_v36 }
  0xcb   : > { %1913 = vmatpush3.bf16.xpose.msra.mxu1 %v2762_v34  ;;  %1894 = vmatprep.subr.bf16.mxu0 %v3426_v0 }
  0xcc   : > { %1914 = vmatprep.subr.bf16.mxu1 %v3426_v0 }
  0xcd   : > { %522 = vadd.xlane.f32.xlu1 %v400_v51 }
  0xce   : > { %490 = vadd.xlane.f32.xlu0 %v384_v50 }
  0xd1   : > { %524 = vadd.xlane.f32.xlu1 %v401_v60 }
  0xd2   : > { %1895 = vmatpush3.bf16.xpose.msra.mxu0 %v2776_v53  ;;  %492 = vadd.xlane.f32.xlu0 %v385_v10 }
  0xd3   : > { %1915 = vmatpush3.bf16.xpose.msra.mxu1 %v2778_v48  ;;  %1920 = vmatprep.subr.bf16.mxu0 %v3426_v0  ;;  %v844_v48 = vadd.s32 4294967256, %v2902_v63 }
  0xd4   : > { %1940 = vmatprep.subr.bf16.mxu1 %v3426_v0 }
  0xd5   : > { %526 = vadd.xlane.f32.xlu1 %v402_v5  ;;  %v2906_v5 = vshrl.u32 %v810_v21, 7 }
  0xd6   : > { %494 = vadd.xlane.f32.xlu0 %v386_v2 }
  0xd9   : > { %1897 = vmatmul.mubr.bf16.vlgmr.msra.gmra.mrb[4].mxu0 %v548_v13  ;;  %528 = vadd.xlane.f32.xlu1 %v403_v26  ;;  %v816_v13 = vadd.s32 4294967288, %v2902_v63 }
  0xda   : > { %1917 = vmatmul.mubr.bf16.vlgmr.msra.gmra.mrb[4].mxu1 %v549_v17  ;;  %1921 = vmatpush3.bf16.msra.mxu0 %v2463_v4  ;;  %v405_v4 = vmul.f32 %v2476_v9, %v306_v49  ;;  %v823_v17 = vadd.s32 4294967280, %v2902_v63 }
  0xdb   : > { %1922 = vmatprep.subr.bf16.mxu0 %v3426_v0  ;;  %1941 = vmatpush3.bf16.msra.mxu1 %v2466_v6  ;;  %v389_v6 = vmul.f32 %v2476_v9, %v290_v46  ;;  %v321_v9 = vmul.f32 %v2661_v59, %v2555_v44 }
  0xdc   : > { %1942 = vmatprep.subr.bf16.mxu1 %v3426_v0  ;;  %496 = vadd.xlane.f32.xlu0 %v387_v31  ;;  %v2916_v31 = vsub.s32 %v2902_v63, %v2906_v5 }
  0xdd   : > { %1936 = vmatprep.mubr.msk.bf16.mxu0 %vm3432_vm0, %v3426_v0  ;;  %1956 = vmatprep.mubr.msk.bf16.mxu1 %vm3432_vm0, %v3426_v0  ;;  %vm1200_vm0 = vcmp.lt.s32.totalorder %v2902_v63, 8 }
  0xde   : > { %1923 = vmatpush3.bf16.msra.mxu0 %v2483_v14  ;;  %530 = vadd.xlane.f32.xlu1 %v404_v22  ;;  %v319_v14 = vmul.f32 %v2661_v59, %v2547_v42  ;;  %v2919_v22 = vsub.s32 %v816_v13, %v2906_v5 }
  0xdf   : > { %1924 = vmatprep.subr.bf16.mxu0 %v3426_v0  ;;  %1943 = vmatpush3.bf16.msra.mxu1 %v2486_v16  ;;  %v318_v16 = vmul.f32 %v2661_v59, %v2542_v40 }
  0xe0   : > { %1944 = vmatprep.subr.bf16.mxu1 %v3426_v0  ;;  %498 = vadd.xlane.f32.xlu0 %v388_v24 }
  0xe2   : > { %1925 = vmatpush3.bf16.msra.mxu0 %v2522_v28  ;;  %532 = vadd.xlane.f32.xlu1 %v405_v4  ;;  %v320_v28 = vmul.f32 %v2661_v59, %v2552_v43  ;;  %v830_v4 = vadd.s32 4294967272, %v2902_v63 }
  0xe3   : > { %1926 = vmatprep.subr.bf16.mxu0 %v3426_v0  ;;  %1945 = vmatpush3.bf16.msra.mxu1 %v2525_v30 }
  0xe4   : > { %1946 = vmatprep.subr.bf16.mxu1 %v3426_v0  ;;  %500 = vadd.xlane.f32.xlu0 %v389_v6  ;;  %v2925_v6 = vsub.s32 %v823_v17, %v2906_v5 }
  0xe6   : > { %1927 = vmatpush3.bf16.msra.mxu0 %v2538_v38  ;;  %332 = vadd.xlane.f32.xlu1 %v319_v14 }
  0xe7   : > { %1928 = vmatprep.subr.bf16.mxu0 %v3426_v0  ;;  %1947 = vmatpush3.bf16.msra.mxu1 %v2544_v41 }
  0xe8   : > { %1948 = vmatprep.subr.bf16.mxu1 %v3426_v0  ;;  %330 = vadd.xlane.f32.xlu0 %v318_v16 }
  0xe9   : > { %v2831_v30 = vpop.xlane.xlu1 %438 }
  0xea   : > { %1929 = vmatpush3.bf16.msra.mxu0 %v2574_v52  ;;  %v2833_v40 = vpop.xlane.xlu0 %406  ;;  %336 = vadd.xlane.f32.xlu1 %v321_v9  ;;  %v837_v9 = vadd.s32 4294967264, %v2902_v63  ;;  %v924_v21 = vrot.slane %v2831_v30, %v2916_v31 }
  0xeb   : > { %1930 = vmatprep.subr.bf16.mxu0 %v3426_v0  ;;  %1949 = vmatpush3.bf16.msra.mxu1 %v2577_v54  ;;  %v815_v14 = vrot.slane %v2833_v40, %v2916_v31 }
  0xec   : > { %1950 = vmatprep.subr.bf16.mxu1 %v3426_v0  ;;  %334 = vadd.xlane.f32.xlu0 %v320_v28  ;;  %v2948_v30 = vsub.s32 %v837_v9, %v2906_v5 }
  0xed   : > { %v2839_v38 = vpop.xlane.xlu1 %440 }
  0xee   : > { %1931 = vmatpush3.bf16.msra.mxu0 %v2590_v62  ;;  %v409_v41 = vpop.xlane.xlu0 %408  ;;  %v928_v13 = vrot.slane %v2839_v38, %v2919_v22 }
  0xef   : > { %1932 = vmatprep.subr.bf16.mxu0 %v3426_v0  ;;  %1951 = vmatpush3.bf16.msra.mxu1 %v2593_v1  ;;  %v820_v16 = vrot.slane %v409_v41, %v2919_v22 }
  0xf0   : > { %1952 = vmatprep.subr.bf16.mxu1 %v3426_v0  ;;  %v929_v38 = vsel %vm821_vm1, %v928_v13, %v924_v21 }
  0xf1   : > { %v2845_v42 = vpop.xlane.xlu1 %442  ;;  %v822_v41 = vsel %vm821_vm1, %v820_v16, %v815_v14 }
  0xf2   : > { %1933 = vmatpush3.bf16.msra.mxu0 %v2606_v12  ;;  %v411_v43 = vpop.xlane.xlu0 %410  ;;  %v933_v34 = vrot.slane %v2845_v42, %v2925_v6  ;;  %v2960_v42 = vsub.s32 %v844_v48, %v2906_v5 }
  0xf3   : > { %1934 = vmatprep.subr.bf16.mxu0 %v3426_v0  ;;  %1953 = vmatpush3.bf16.msra.mxu1 %v2609_v15  ;;  %v827_v40 = vrot.slane %v411_v43, %v2925_v6  ;;  %v851_v43 = vadd.s32 4294967248, %v2902_v63 }
  0xf4   : > { %1954 = vmatprep.subr.bf16.mxu1 %v3426_v0  ;;  %v934_v21 = vsel %vm828_vm2, %v933_v34, %v929_v38 }
  0xf5   : > { %v2851_v44 = vpop.xlane.xlu1 %444  ;;  %v829_v53 = vsel %vm828_vm2, %v827_v40, %v822_v41  ;;  %v858_v40 = vadd.s32 4294967240, %v2902_v63 }
  0xf6   : > { %1935 = vmatpush3.bf16.msra.mxu0 %v2622_v29  ;;  %v2856_v52 = vpop.xlane.xlu0 %412 }
  0xf7   : > { %1955 = vmatpush3.bf16.msra.mxu1 %v2630_v33  ;;  %1960 = vmatprep.subr.bf16.mxu0 %v3426_v0 }
  0xf8   : > { %1980 = vmatprep.subr.bf16.mxu1 %v3426_v0  ;;  %v2938_v0 = vsub.s32 %v830_v4, %v2906_v5 }
  0xf9   : > { %v2858_v54 = vpop.xlane.xlu1 %446 }
  0xfa   : > { %v2860_v62 = vpop.xlane.xlu0 %414  ;;  %v834_v4 = vrot.slane %v2856_v52, %v2938_v0  ;;  %v938_v16 = vrot.slane %v2851_v44, %v2938_v0  ;;  %v943_v41 = vrot.slane %v2858_v54, %v2948_v30  ;;  %v2972_v44 = vsub.s32 %v851_v43, %v2906_v5 }
  0xfb   : > { %v841_v52 = vrot.slane %v2860_v62, %v2948_v30  ;;  %v865_v62 = vadd.s32 4294967232, %v2902_v63  ;;  %v2984_v54 = vsub.s32 %v858_v40, %v2906_v5 }
  0xfc   : > { %v836_v13 = vsel %vm835_vm3, %v834_v4, %v829_v53  ;;  %v939_v48 = vsel %vm835_vm3, %v938_v16, %v934_v21  ;;  %v872_v21 = vadd.s32 4294967224, %v2902_v63 }
  0xfd   : > { %v2862_v1 = vpop.xlane.xlu1 %448  ;;  %v843_v34 = vsel %vm842_vm4, %v841_v52, %v836_v13  ;;  %v944_v43 = vsel %vm842_vm4, %v943_v41, %v939_v48 }
  0xfe   : > { %v2864_v12 = vpop.xlane.xlu0 %416  ;;  %v948_v38 = vrot.slane %v2862_v1, %v2960_v42  ;;  %v2996_v1 = vsub.s32 %v865_v62, %v2906_v5 }
  0xff   : > { %v848_v11 = vrot.slane %v2864_v12, %v2960_v42 }
 0x100   : > { %v949_v13 = vsel %vm849_vm5, %v948_v38, %v944_v43  ;;  %v886_v43 = vadd.s32 4294967208, %v2902_v63 }
 0x101   : > { %v2866_v15 = vpop.xlane.xlu1 %450  ;;  %v850_v16 = vsel %vm849_vm5, %v848_v11, %v843_v34 }
 0x102   : > { %v2868_v29 = vpop.xlane.xlu0 %418  ;;  %v953_v52 = vrot.slane %v2866_v15, %v2972_v44  ;;  %v3008_v15 = vsub.s32 %v872_v21, %v2906_v5 }
 0x103   : > { %v855_v12 = vrot.slane %v2868_v29, %v2972_v44  ;;  %v879_v29 = vadd.s32 4294967216, %v2902_v63 }
 0x104   : > { %v954_v62 = vsel %vm856_vm6, %v953_v52, %v949_v13 }
 0x105   : > { %v2870_v59 = vpop.xlane.xlu1 %452  ;;  %v857_v41 = vsel %vm856_vm6, %v855_v12, %v850_v16 }
 0x106   : > { %v2872_v33 = vpop.xlane.xlu0 %420  ;;  %v958_v48 = vrot.slane %v2870_v59, %v2984_v54  ;;  %v3020_v59 = vsub.s32 %v879_v29, %v2906_v5 }
 0x107   : > { %v862_v40 = vrot.slane %v2872_v33, %v2984_v54 }
 0x108   : > { %v959_v16 = vsel %vm863_vm7, %v958_v48, %v954_v62  ;;  %v900_v62 = vadd.s32 4294967192, %v2902_v63 }
 0x109   : > { %v2876_v25 = vpop.xlane.xlu1 %454  ;;  %v864_v38 = vsel %vm863_vm7, %v862_v40, %v857_v41 }
 0x10a   : > { %v2874_v23 = vpop.xlane.xlu0 %422  ;;  %v963_v12 = vrot.slane %v2876_v25, %v2996_v1  ;;  %v3032_v25 = vsub.s32 %v886_v43, %v2906_v5 }
 0x10b   : > { %v869_v33 = vrot.slane %v2874_v23, %v2996_v1  ;;  %v893_v23 = vadd.s32 4294967200, %v2902_v63 }
 0x10c   : > { %v964_v29 = vsel %vm870_vm8, %v963_v12, %v959_v16 }
 0x10d   : > { %v2880_v35 = vpop.xlane.xlu1 %456  ;;  %v871_v52 = vsel %vm870_vm8, %v869_v33, %v864_v38 }
 0x10e   : > { %v2878_v27 = vpop.xlane.xlu0 %424  ;;  %v968_v40 = vrot.slane %v2880_v35, %v3008_v15  ;;  %v3044_v35 = vsub.s32 %v893_v23, %v2906_v5 }
 0x10f   : > { %v876_v21 = vrot.slane %v2878_v27, %v3008_v15 }
 0x110   : > { %v969_v38 = vsel %vm877_vm9, %v968_v40, %v964_v29  ;;  %v914_v29 = vadd.s32 4294967176, %v2902_v63 }
 0x111   : > { %v2884_v45 = vpop.xlane.xlu1 %458  ;;  %v878_v48 = vsel %vm877_vm9, %v876_v21, %v871_v52 }
 0x112   : > { %v2882_v36 = vpop.xlane.xlu0 %426  ;;  %v973_v33 = vrot.slane %v2884_v45, %v3020_v59  ;;  %v3056_v45 = vsub.s32 %v900_v62, %v2906_v5 }
 0x113   : > { %v883_v27 = vrot.slane %v2882_v36, %v3020_v59  ;;  %v907_v36 = vadd.s32 4294967184, %v2902_v63 }
 0x114   : > { %v974_v23 = vsel %vm884_vm10, %v973_v33, %v969_v38 }
 0x115   : > { %v2888_v47 = vpop.xlane.xlu1 %460  ;;  %v885_v12 = vsel %vm884_vm10, %v883_v27, %v878_v48 }
 0x116   : > { %v2886_v46 = vpop.xlane.xlu0 %428  ;;  %v978_v21 = vrot.slane %v2888_v47, %v3032_v25  ;;  %v3068_v47 = vsub.s32 %v907_v36, %v2906_v5 }
 0x117   : > { %v890_v43 = vrot.slane %v2886_v46, %v3032_v25 }
 0x118   : > { %v979_v48 = vsel %vm891_vm11, %v978_v21, %v974_v23 }
 0x119   : > { %v2892_v51 = vpop.xlane.xlu1 %462  ;;  %v892_v40 = vsel %vm891_vm11, %v890_v43, %v885_v12  ;;  %v3079_v43 = vsub.s32 %v914_v29, %v2906_v5 }
 0x11a   : > { %v2890_v49 = vpop.xlane.xlu0 %430  ;;  %v983_v27 = vrot.slane %v2892_v51, %v3044_v35 }
 0x11b   : > { %v897_v46 = vrot.slane %v2890_v49, %v3044_v35 }
 0x11c   : > { %v984_v12 = vsel %vm898_vm12, %v983_v27, %v979_v48 }
 0x11d   : > { %v2896_v60 = vpop.xlane.xlu1 %464  ;;  %v899_v33 = vsel %vm898_vm12, %v897_v46, %v892_v40 }
 0x11e   : > { %v2894_v50 = vpop.xlane.xlu0 %432  ;;  %v988_v38 = vrot.slane %v2896_v60, %v3056_v45 }
 0x11f   : > { %v904_v62 = vrot.slane %v2894_v50, %v3056_v45 }
 0x120   : > { %v989_v23 = vsel %vm905_vm13, %v988_v38, %v984_v12 }
 0x121   : > { %v2900_v10 = vpop.xlane.xlu1 %466  ;;  %v906_v50 = vsel %vm905_vm13, %v904_v62, %v899_v33 }
 0x122   : > { %v2898_v61 = vpop.xlane.xlu0 %434  ;;  %v993_v21 = vrot.slane %v2900_v10, %v3068_v47 }
 0x123   : > { %v911_v36 = vrot.slane %v2898_v61, %v3068_v47 }
 0x124   : > { %v994_v27 = vsel %vm912_vm14, %v993_v21, %v989_v23 }
 0x125   : > { %v2909_v2 = vpop.xlane.xlu1 %468  ;;  %v913_v5 = vsel %vm912_vm14, %v911_v36, %v906_v50 }
 0x126   : > { %v2904_v3 = vpop.xlane.xlu0 %436  ;;  %v998_v40 = vrot.slane %v2909_v2, %v3079_v43 }
 0x127   : > { %v918_v60 = vrot.slane %v2904_v3, %v3079_v43 }
 0x128   : > { %v999_v23 = vsel %vm919_vm15, %v998_v40, %v994_v27 }
 0x129   : > { %v920_v12 = vsel %vm919_vm15, %v918_v60, %v913_v5 }
 0x12a   : > { %v2921_v24 = vpop.xlane.xlu1 %324 }
 0x12b   : > { %v2912_v26 = vpop.xlane.xlu0 %322 }
 0x12e   : > { %v2940_v17 = vpop.xlane.xlu1 %328 }
 0x12f   : > { %v2931_v28 = vpop.xlane.xlu0 %326 }
 0x132   : > { %v2962_v9 = vpop.xlane.xlu1 %472 }
 0x133   : > { %v2955_v14 = vpop.xlane.xlu0 %470 }
 0x136   : > { %v2986_v4 = vpop.xlane.xlu1 %504 }
 0x137   : > { %v2979_v53 = vpop.xlane.xlu0 %502 }
 0x13a   : > { %v3010_v34 = vpop.xlane.xlu1 %506 }
 0x13b   : > { %v3003_v11 = vpop.xlane.xlu0 %474 }
 0x13e   : > { %v3034_v41 = vpop.xlane.xlu1 %508 }
 0x13f   : > { %v3027_v13 = vpop.xlane.xlu0 %476 }
 0x142   : > { %v3058_v52 = vpop.xlane.xlu1 %510 }
 0x143   : > { %v3051_v16 = vpop.xlane.xlu0 %478 }
 0x146   : > { %v3081_v51 = vpop.xlane.xlu1 %512 }
 0x147   : > { %v3074_v49 = vpop.xlane.xlu0 %480 }
 0x14a   : > { %v3097_v61 = vpop.xlane.xlu1 %514 }
 0x14b   : > { %v3093_v46 = vpop.xlane.xlu0 %482 }
 0x14e   : > { %v517_v60 = vpop.xlane.xlu1 %516 }
 0x152   : > { %v519_v27 = vpop.xlane.xlu1 %518 }
 0x16c   : > { %v616_v29 = vpop.f32.mrb[0].mxu0 }
 0x16d   : > { %v657_v48 = vpop.f32.mrb[0].mxu1  ;;  %v617_v10 = vadd.f32 %v616_v29, %v2912_v26  ;;  %v1858_v62 = vpop.f32.mrb[1].mxu0 }
 0x16e   : > { %v658_v33 = vadd.f32 %v657_v48, %v2931_v28  ;;  %v1878_v3 = vpop.f32.mrb[1].mxu1  ;;  %v619_v38 = vpop.f32.mrb[2].mxu0 }
 0x16f   : > { %v620_v36 = vadd.f32 %v619_v38, %v2921_v24  ;;  %v660_v2 = vpop.f32.mrb[2].mxu1  ;;  %v1859_v50 = vpop.f32.mrb[3].mxu0  ;;  %v1192_v32 = vadd.f32 %v920_v12, %v617_v10  ;;  %v1082_v3 = vrot.slane %v2979_v53, %v2916_v31  ;;  %v1086_v38 = vrot.slane %v2986_v4, %v2919_v22 }
 0x170   : > { %v661_v58 = vadd.f32 %v660_v2, %v2940_v17  ;;  %v1879_v21 = vpop.f32.mrb[3].mxu1  ;;  %v485_v26 = vpop.xlane.xlu0 %484  ;;  %v1194_v48 = vadd.f32 %v999_v23, %v658_v33  ;;  %v1007_v33 = vrot.slane %v2962_v9, %v2919_v22  ;;  %v1017_v9 = vrot.slane %v3027_v13, %v2938_v0 }
 0x171   : > { %v3109_v28 = vsel %vm1200_vm0, %v1192_v32, -1e+30  ;;  %v1193_v29 = vadd.f32 %v920_v12, %v620_v36  ;;  %v521_v62 = vpop.xlane.xlu1 %520  ;;  %v1012_v12 = vrot.slane %v3003_v11, %v2925_v6  ;;  %v1091_v21 = vrot.slane %v3010_v34, %v2925_v6 }
 0x172   : > { %1211 = vmax.xlane.f32.xlu0 %v3109_v28  ;;  %v1195_v5 = vadd.f32 %v999_v23, %v661_v58  ;;  %v3119_v17 = vsel %vm1200_vm0, %v1194_v48, -1e+30  ;;  %v1003_v58 = vrot.slane %v2955_v14, %v2916_v31  ;;  %v1087_v14 = vsel %vm821_vm1, %v1086_v38, %v1082_v3 }
 0x173   : > { %v3114_v24 = vsel %vm1200_vm0, %v1193_v29, -1e+30  ;;  %v1096_v22 = vrot.slane %v3034_v41, %v2938_v0  ;;  %v1092_v53 = vsel %vm828_vm2, %v1091_v21, %v1087_v14  ;;  %v1022_v4 = vrot.slane %v3051_v16, %v2948_v30 }
 0x174   : > { %1213 = vmax.xlane.f32.xlu1 %v3114_v24  ;;  %v487_v32 = vpop.xlane.xlu0 %486  ;;  %v3124_v40 = vsel %vm1200_vm0, %v1195_v5, -1e+30  ;;  %v1008_v2 = vsel %vm821_vm1, %v1007_v33, %v1003_v58  ;;  %v1101_v6 = vrot.slane %v3058_v52, %v2948_v30  ;;  %v1027_v13 = vrot.slane %v3074_v49, %v2960_v42 }
 0x175   : > { %v523_v50 = vpop.xlane.xlu1 %522  ;;  %v1013_v31 = vsel %vm828_vm2, %v1012_v12, %v1008_v2  ;;  %v1097_v34 = vsel %vm835_vm3, %v1096_v22, %v1092_v53  ;;  %v1106_v0 = vrot.slane %v3081_v51, %v2960_v42  ;;  %v1032_v16 = vrot.slane %v3093_v46, %v2972_v44 }
 0x176   : > { %1215 = vmax.xlane.f32.xlu0 %v3119_v17  ;;  %v1018_v23 = vsel %vm835_vm3, %v1017_v9, %v1013_v31  ;;  %v1102_v41 = vsel %vm842_vm4, %v1101_v6, %v1097_v34  ;;  %v1111_v30 = vrot.slane %v3097_v61, %v2972_v44  ;;  %v1037_v49 = vrot.slane %v485_v26, %v2984_v54 }
 0x177   : > { %v1023_v48 = vsel %vm842_vm4, %v1022_v4, %v1018_v23  ;;  %v1107_v52 = vsel %vm849_vm5, %v1106_v0, %v1102_v41  ;;  %v1116_v42 = vrot.slane %v517_v60, %v2984_v54  ;;  %v1042_v38 = vrot.slane %v487_v32, %v2996_v1 }
 0x178   : > { %1217 = vmax.xlane.f32.xlu1 %v3124_v40  ;;  %v489_v10 = vpop.xlane.xlu0 %488  ;;  %v1028_v58 = vsel %vm849_vm5, %v1027_v13, %v1023_v48  ;;  %v1112_v51 = vsel %vm856_vm6, %v1111_v30, %v1107_v52  ;;  %v1121_v21 = vrot.slane %v519_v27, %v2996_v1  ;;  %v1126_v14 = vrot.slane %v521_v62, %v3008_v15 }
 0x179   : > { %v525_v29 = vpop.xlane.xlu1 %524  ;;  %v1033_v3 = vsel %vm856_vm6, %v1032_v16, %v1028_v58  ;;  %v1117_v44 = vsel %vm863_vm7, %v1116_v42, %v1112_v51  ;;  %v1047_v61 = vrot.slane %v489_v10, %v3008_v15  ;;  %v1131_v22 = vrot.slane %v523_v50, %v3020_v59 }
 0x17a   : > { %v1038_v12 = vsel %vm863_vm7, %v1037_v49, %v1033_v3  ;;  %v1122_v54 = vsel %vm870_vm8, %v1121_v21, %v1117_v44  ;;  %v1136_v53 = vrot.slane %v525_v29, %v3032_v25 }
 0x17b   : > { %v1043_v26 = vsel %vm870_vm8, %v1042_v38, %v1038_v12  ;;  %v1127_v1 = vsel %vm877_vm9, %v1126_v14, %v1122_v54 }
 0x17c   : > { %v491_v36 = vpop.xlane.xlu0 %490  ;;  %v1048_v32 = vsel %vm877_vm9, %v1047_v61, %v1043_v26  ;;  %v1132_v15 = vsel %vm884_vm10, %v1131_v22, %v1127_v1 }
 0x17d   : > { %v527_v33 = vpop.xlane.xlu1 %526  ;;  %v1052_v60 = vrot.slane %v491_v36, %v3020_v59  ;;  %v1137_v59 = vsel %vm891_vm11, %v1136_v53, %v1132_v15 }
 0x17e   : > { %v1141_v6 = vrot.slane %v527_v33, %v3044_v35 }
 0x17f   : > { %v1053_v10 = vsel %vm884_vm10, %v1052_v60, %v1048_v32 }
 0x180   : > { %v493_v11 = vpop.xlane.xlu0 %492  ;;  %v1142_v29 = vsel %vm898_vm12, %v1141_v6, %v1137_v59 }
 0x181   : > { %v529_v2 = vpop.xlane.xlu1 %528  ;;  %v1057_v27 = vrot.slane %v493_v11, %v3032_v25 }
 0x182   : > { %v1146_v13 = vrot.slane %v529_v2, %v3056_v45 }
 0x183   : > { %v1058_v36 = vsel %vm891_vm11, %v1057_v27, %v1053_v10 }
 0x184   : > { %v495_v5 = vpop.xlane.xlu0 %494 }
 0x185   : > { %v531_v31 = vpop.xlane.xlu1 %530  ;;  %v1062_v62 = vrot.slane %v495_v5, %v3044_v35  ;;  %v1147_v35 = vsel %vm905_vm13, %v1146_v13, %v1142_v29 }
 0x186   : > { %v1151_v41 = vrot.slane %v531_v31, %v3068_v47 }
 0x187   : > { %v1063_v11 = vsel %vm898_vm12, %v1062_v62, %v1058_v36 }
 0x188   : > { %v497_v46 = vpop.xlane.xlu0 %496  ;;  %v1152_v52 = vsel %vm912_vm14, %v1151_v41, %v1147_v35 }
 0x189   : > { %v533_v23 = vpop.xlane.xlu1 %532  ;;  %v1067_v50 = vrot.slane %v497_v46, %v3056_v45 }
 0x18a   : > { %v1156_v33 = vrot.slane %v533_v23, %v3079_v43 }
 0x18b   : > { %v1068_v0 = vsel %vm905_vm13, %v1067_v50, %v1063_v11 }
 0x18c   : > { %v499_v9 = vpop.xlane.xlu0 %498 }
 0x18d   : > { %v333_v25 = vpop.xlane.xlu1 %332  ;;  %v1072_v48 = vrot.slane %v499_v9, %v3068_v47 }
 0x18f   : > { %v1073_v5 = vsel %vm912_vm14, %v1072_v48, %v1068_v0 }
 0x190   : > { %v501_v4 = vpop.xlane.xlu0 %500 }
 0x191   : > { %v1077_v16 = vrot.slane %v501_v4, %v3079_v43  ;;  %v337_v45 = vpop.xlane.xlu1 %336  ;;  %v1157_v43 = vsel %vm919_vm15, %v1156_v33, %v1152_v52 }
 0x193   : > { %v1078_v47 = vsel %vm919_vm15, %v1077_v16, %v1073_v5 }
 0x194   : > { %v331_v34 = vpop.xlane.xlu0 %330 }
 0x198   : > { %v335_v58 = vpop.xlane.xlu0 %334 }
 0x1ac   : > { %v698_v30 = vpop.f32.mrb[4].mxu0 }
 0x1ad   : > { %v699_v49 = vadd.f32 %v698_v30, %v331_v34  ;;  %v739_v3 = vpop.f32.mrb[4].mxu1  ;;  %v1898_v42 = vpop.f32.mrb[5].mxu0 }
 0x1ae   : > { %v740_v51 = vadd.f32 %v739_v3, %v335_v58  ;;  %v1918_v38 = vpop.f32.mrb[5].mxu1  ;;  %v701_v46 = vpop.f32.mrb[6].mxu0 }
 0x1af   : > { %v742_v12 = vpop.f32.mrb[6].mxu1  ;;  %v702_v2 = vadd.f32 %v701_v46, %v333_v25  ;;  %v1899_v21 = vpop.f32.mrb[7].mxu0  ;;  %v1196_v44 = vadd.f32 %v1078_v47, %v699_v49 }
 0x1b0   : > { %v743_v61 = vadd.f32 %v742_v12, %v337_v45  ;;  %v1919_v26 = vpop.f32.mrb[7].mxu1  ;;  %v1198_v60 = vadd.f32 %v1157_v43, %v740_v51 }
 0x1b1   : > { %v3205_v14 = vsel %vm1200_vm0, %v1196_v44, -1e+30  ;;  %v1197_v54 = vadd.f32 %v1078_v47, %v702_v2 }
 0x1b2   : > { %1219 = vmax.xlane.f32.xlu0 %v3205_v14  ;;  %v1199_v32 = vadd.f32 %v1157_v43, %v743_v61  ;;  %v3215_v31 = vsel %vm1200_vm0, %v1198_v60, -1e+30 }
 0x1b3   : > { %v3210_v9 = vsel %vm1200_vm0, %v1197_v54, -1e+30 }
 0x1b4   : > { %1221 = vmax.xlane.f32.xlu1 %v3210_v9  ;;  %v3220_v22 = vsel %vm1200_vm0, %v1199_v32, -1e+30  ;;  %vm3450_vm0 = vmmov 0  }
 0x1b6   : > { %1223 = vmax.xlane.f32.xlu0 %v3215_v31 }
 0x1b8   : > { %1225 = vmax.xlane.f32.xlu1 %v3220_v22 }
 0x1ff   : > { %v1212_v1 = vpop.xlane.xlu0 %1211 }
 0x200   : > { %v1227_v27 = vsub.f32 %v3109_v28, %v1212_v1 }
 0x201   : > { %v1214_v10 = vpop.xlane.xlu1 %1213 }
 0x202   : > { %v1235_v53 = vmul.f32 1.442695, %v1227_v27  ;;  %v1228_v15 = vsub.f32 %v3114_v24, %v1214_v10  ;;  %v1451_v62 = vmax.f32 %v1212_v1, %v1214_v10 }
 0x203   : > { %v1216_v4 = vpop.xlane.xlu0 %1215 }
 0x204   : > { %2057 = vpow2.f32 %v1235_v53  ;;  %v1237_v36 = vmul.f32 1.442695, %v1228_v15  ;;  %v1452_v23 = vrot.slane %v1451_v62, 4  ;;  %v1229_v6 = vsub.f32 %v3119_v17, %v1216_v4 }
 0x205   : > { %v1218_v59 = vpop.xlane.xlu1 %1217 }
 0x206   : > { %2059 = vpow2.f32 %v1237_v36  ;;  %v1453_v63 = vmax.f32 %v1451_v62, %v1452_v23  ;;  %v1239_v50 = vmul.f32 1.442695, %v1229_v6  ;;  %v1230_v11 = vsub.f32 %v3124_v40, %v1218_v59  ;;  %v3240_v6 = vld [vmem:[%s2502_s27] sm:$0xff] }
 0x207   : > { %v1458_v34 = vmax.f32 %v1216_v4, %v1218_v59 }
 0x208   : > { %v1454_v13 = vrot.slane %v1453_v63, 2  ;;  %2061 = vpow2.f32 %v1239_v50  ;;  %v1241_v28 = vmul.f32 1.442695, %v1230_v11 }
 0x209   : > { %v1459_v25 = vrot.slane %v1458_v34, 4 }
 0x20a   : > { %v1455_v29 = vmax.f32 %v1453_v63, %v1454_v13  ;;  %2063 = vpow2.f32 %v1241_v28  ;;  %v3244_v63 = vld [vmem:[%s2502_s27 + $0x20] sm:$0xff] }
 0x20b   : > { %v1460_v24 = vmax.f32 %v1458_v34, %v1459_v25 }
 0x20c   : > { %v1456_v48 = vrot.slane %v1455_v29, 1 }
 0x20d   : > { %v1461_v0 = vrot.slane %v1460_v24, 2 }
 0x20e   : > { %v3227_v41 = vpop.eup %2057  ;;  %v1457_v35 = vmax.f32 %v1455_v29, %v1456_v48 }
 0x20f   : > { %v1462_v17 = vmax.f32 %v1460_v24, %v1461_v0  ;;  %1251 = vadd.xlane.f32.xlu0 %v3227_v41  ;;  %v3248_v24 = vld [vmem:[%s2502_s27 + $0x40] sm:$0xff] }
 0x210   : > { %v3230_v16 = vpop.eup %2059  ;;  %v1479_v5 = vsub.f32 %v1212_v1, %v1457_v35  ;;  %v1480_v40 = vsub.f32 %v1214_v10, %v1457_v35  ;;  %v3252_v0 = vld [vmem:[%s2502_s27 + $0x60] sm:$0xff] }
 0x211   : > { %v1463_v58 = vrot.slane %v1462_v17, 1  ;;  %1253 = vadd.xlane.f32.xlu1 %v3230_v16 }
 0x212   : > { %v3233_v33 = vpop.eup %2061  ;;  %v1487_v30 = vmul.f32 1.442695, %v1479_v5  ;;  %v1489_v45 = vmul.f32 1.442695, %v1480_v40 }
 0x213   : > { %v1464_v52 = vmax.f32 %v1462_v17, %v1463_v58  ;;  %1255 = vadd.xlane.f32.xlu0 %v3233_v33 }
 0x214   : > { %v3236_v49 = vpop.eup %2063  ;;  %2065 = vpow2.f32 %v1487_v30 }
 0x215   : > { %2067 = vpow2.f32 %v1489_v45  ;;  %v1481_v3 = vsub.f32 %v1216_v4, %v1464_v52  ;;  %v1482_v42 = vsub.f32 %v1218_v59, %v1464_v52  ;;  %1257 = vadd.xlane.f32.xlu1 %v3236_v49 }
 0x217   : > { %v1491_v51 = vmul.f32 1.442695, %v1481_v3  ;;  %v1493_v38 = vmul.f32 1.442695, %v1482_v42 }
 0x219   : > { %2069 = vpow2.f32 %v1491_v51 }
 0x21a   : > { %2071 = vpow2.f32 %v1493_v38 }
 0x21e   : > { %v2066_v46 = vpop.eup %2065 }
 0x21f   : > { %v2068_v47 = vpop.eup %2067 }
 0x220   : > { %v1503_v12 = vadd.f32 %v2068_v47, %v2066_v46 }
 0x222   : > { %v1504_v2 = vrot.slane %v1503_v12, 4 }
 0x223   : > { %v2070_v21 = vpop.eup %2069 }
 0x224   : > { %v2072_v44 = vpop.eup %2071  ;;  %v1505_v61 = vadd.f32 %v1504_v2, %v1503_v12 }
 0x225   : > { %v1510_v26 = vadd.f32 %v2072_v44, %v2070_v21 }
 0x226   : > { %v1506_v43 = vrot.slane %v1505_v61, 2 }
 0x227   : > { %v1511_v54 = vrot.slane %v1510_v26, 4 }
 0x228   : > { %v1507_v60 = vadd.f32 %v1506_v43, %v1505_v61 }
 0x229   : > { %v1512_v32 = vadd.f32 %v1511_v54, %v1510_v26 }
 0x22a   : > { %v1508_v1 = vrot.slane %v1507_v60, 1 }
 0x22b   : > { %v1513_v27 = vrot.slane %v1512_v32, 2 }
 0x22c   : > { %v1509_v10 = vadd.f32 %v1508_v1, %v1507_v60 }
 0x22d   : > { %v1514_v53 = vadd.f32 %v1513_v27, %v1512_v32 }
 0x22e   : > { %2073 = vrcp.f32 %v1509_v10 }
 0x22f   : > { %v1515_v15 = vrot.slane %v1514_v53, 1 }
 0x231   : > { %v1516_v62 = vadd.f32 %v1515_v15, %v1514_v53 }
 0x233   : > { %2075 = vrcp.f32 %v1516_v62 }
 0x238   : > { %v2074_v4 = vpop.eup %2073 }
 0x239   : > { %v1535_v36 = vmul.f32 %v2074_v4, %v2066_v46  ;;  %v1536_v23 = vmul.f32 %v2074_v4, %v2068_v47 }
 0x23b   : > { %v1543_v59 = vmul.f32 %v3240_v6, %v1535_v36  ;;  %v1544_v50 = vmul.f32 %v3244_v63, %v1536_v23 }
 0x23d   : > { %v2076_v11 = vpop.eup %2075  ;;  %v1551_v34 = vadd.f32 %v1544_v50, %v1543_v59 }
 0x23e   : > { %v1537_v13 = vmul.f32 %v2076_v11, %v2070_v21  ;;  %v1538_v28 = vmul.f32 %v2076_v11, %v2072_v44 }
 0x23f   : > { %v1552_v25 = vrot.slane %v1551_v34, 4  ;;  %v1220_v29 = vpop.xlane.xlu0 %1219 }
 0x240   : > { %v1545_v48 = vmul.f32 %v3248_v24, %v1537_v13  ;;  %v1546_v35 = vmul.f32 %v3252_v0, %v1538_v28  ;;  %v1231_v17 = vsub.f32 %v3205_v14, %v1220_v29 }
 0x241   : > { %v1553_v5 = vadd.f32 %v1552_v25, %v1551_v34  ;;  %v1222_v40 = vpop.xlane.xlu1 %1221 }
 0x242   : > { %v1558_v58 = vadd.f32 %v1546_v35, %v1545_v48  ;;  %v1243_v30 = vmul.f32 1.442695, %v1231_v17  ;;  %v1232_v45 = vsub.f32 %v3210_v9, %v1222_v40  ;;  %v1465_v52 = vmax.f32 %v1220_v29, %v1222_v40 }
 0x243   : > { %v1554_v3 = vrot.slane %v1553_v5, 2  ;;  %v1224_v42 = vpop.xlane.xlu0 %1223 }
 0x244   : > { %v1559_v51 = vrot.slane %v1558_v58, 4  ;;  %2077 = vpow2.f32 %v1243_v30  ;;  %v1245_v38 = vmul.f32 1.442695, %v1232_v45  ;;  %v1466_v46 = vrot.slane %v1465_v52, 4 }
 0x245   : > { %v1555_v47 = vadd.f32 %v1554_v3, %v1553_v5  ;;  %v1233_v12 = vsub.f32 %v3215_v31, %v1224_v42  ;;  %v1226_v2 = vpop.xlane.xlu1 %1225 }
 0x246   : > { %v1560_v21 = vadd.f32 %v1559_v51, %v1558_v58  ;;  %2079 = vpow2.f32 %v1245_v38  ;;  %v1467_v14 = vmax.f32 %v1465_v52, %v1466_v46  ;;  %v1234_v44 = vsub.f32 %v3220_v22, %v1226_v2 }
 0x247   : > { %v1556_v61 = vrot.slane %v1555_v47, 1  ;;  %v1247_v26 = vmul.f32 1.442695, %v1233_v12  ;;  %v1472_v9 = vmax.f32 %v1224_v42, %v1226_v2 }
 0x248   : > { %v1561_v43 = vrot.slane %v1560_v21, 2  ;;  %v1468_v54 = vrot.slane %v1467_v14, 2  ;;  %v1249_v60 = vmul.f32 1.442695, %v1234_v44 }
 0x249   : > { %v1557_v32 = vadd.f32 %v1556_v61, %v1555_v47  ;;  %2081 = vpow2.f32 %v1247_v26  ;;  %v1473_v1 = vrot.slane %v1472_v9, 4 }
 0x24a   : > { %v1562_v27 = vadd.f32 %v1561_v43, %v1560_v21  ;;  %v1469_v10 = vmax.f32 %v1467_v14, %v1468_v54  ;;  %2083 = vpow2.f32 %v1249_v60 }
 0x24b   : > { %v1611_v31 = vmul.f32 %v3240_v6, %v1557_v32  ;;  %v1612_v53 = vmul.f32 %v3244_v63, %v1557_v32  ;;  %v1474_v15 = vmax.f32 %v1472_v9, %v1473_v1 }
 0x24c   : > { %v1563_v22 = vrot.slane %v1562_v27, 1  ;;  %v1470_v62 = vrot.slane %v1469_v10, 1 }
 0x24d   : > { %1619 = vst [vmem:[%s2502_s27 + $0x18] sm:$0xff] %v1611_v31  ;;  %1620 = vst [vmem:[%s2502_s27 + $0x38] sm:$0xff] %v1612_v53  ;;  %v1475_v4 = vrot.slane %v1474_v15, 2  ;;  %v3280_v31 = vld [vmem:[%s2502_s27 + $0x80] sm:$0xff] }
 0x24e   : > { %v3263_v36 = vpop.eup %2077  ;;  %v1564_v23 = vadd.f32 %v1563_v22, %v1562_v27  ;;  %v1471_v59 = vmax.f32 %v1469_v10, %v1470_v62 }
 0x24f   : > { %v1476_v50 = vmax.f32 %v1474_v15, %v1475_v4  ;;  %1259 = vadd.xlane.f32.xlu0 %v3263_v36  ;;  %v3284_v15 = vld [vmem:[%s2502_s27 + $0xa0] sm:$0xff] }
 0x250   : > { %v3266_v11 = vpop.eup %2079  ;;  %v1613_v34 = vmul.f32 %v3248_v24, %v1564_v23  ;;  %v1614_v13 = vmul.f32 %v3252_v0, %v1564_v23  ;;  %v1483_v28 = vsub.f32 %v1220_v29, %v1471_v59  ;;  %v1484_v25 = vsub.f32 %v1222_v40, %v1471_v59 }
 0x251   : > { %v1477_v48 = vrot.slane %v1476_v50, 1  ;;  %1261 = vadd.xlane.f32.xlu1 %v3266_v11 }
 0x252   : > { %1621 = vst [vmem:[%s2502_s27 + $0x58] sm:$0xff] %v1613_v34  ;;  %1622 = vst [vmem:[%s2502_s27 + $0x78] sm:$0xff] %v1614_v13  ;;  %v1495_v35 = vmul.f32 1.442695, %v1483_v28  ;;  %v1497_v17 = vmul.f32 1.442695, %v1484_v25 }
 0x253   : > { %v3273_v5 = vpop.eup %2081  ;;  %v1478_v58 = vmax.f32 %v1476_v50, %v1477_v48  ;;  %v3288_v34 = vld [vmem:[%s2502_s27 + $0xc0] sm:$0xff] }
 0x254   : > { %v3275_v30 = vpop.eup %2083  ;;  %2085 = vpow2.f32 %v1495_v35  ;;  %1263 = vadd.xlane.f32.xlu0 %v3273_v5  ;;  %v3292_v28 = vld [vmem:[%s2502_s27 + $0xe0] sm:$0xff] }
 0x255   : > { %2087 = vpow2.f32 %v1497_v17  ;;  %v1485_v45 = vsub.f32 %v1224_v42, %v1478_v58  ;;  %v1486_v52 = vsub.f32 %v1226_v2, %v1478_v58  ;;  %1265 = vadd.xlane.f32.xlu1 %v3275_v30 }
 0x257   : > { %v1499_v29 = vmul.f32 1.442695, %v1485_v45  ;;  %v1501_v40 = vmul.f32 1.442695, %v1486_v52 }
 0x259   : > { %2089 = vpow2.f32 %v1499_v29 }
 0x25a   : > { %2091 = vpow2.f32 %v1501_v40 }
 0x25e   : > { %v2086_v3 = vpop.eup %2085 }
 0x25f   : > { %v2088_v51 = vpop.eup %2087 }
 0x260   : > { %v1517_v38 = vadd.f32 %v2088_v51, %v2086_v3 }
 0x262   : > { %v1518_v46 = vrot.slane %v1517_v38, 4 }
 0x263   : > { %v2090_v47 = vpop.eup %2089 }
 0x264   : > { %v2092_v12 = vpop.eup %2091  ;;  %v1519_v21 = vadd.f32 %v1518_v46, %v1517_v38 }
 0x265   : > { %v1524_v14 = vadd.f32 %v2092_v12, %v2090_v47 }
 0x266   : > { %v1520_v44 = vrot.slane %v1519_v21, 2 }
 0x267   : > { %v1525_v61 = vrot.slane %v1524_v14, 4 }
 0x268   : > { %v1521_v42 = vadd.f32 %v1520_v44, %v1519_v21 }
 0x269   : > { %v1526_v2 = vadd.f32 %v1525_v61, %v1524_v14 }
 0x26a   : > { %v1522_v26 = vrot.slane %v1521_v42, 1 }
 0x26b   : > { %v1527_v9 = vrot.slane %v1526_v2, 2 }
 0x26c   : > { %v1523_v43 = vadd.f32 %v1522_v26, %v1521_v42 }
 0x26d   : > { %v1528_v54 = vadd.f32 %v1527_v9, %v1526_v2 }
 0x26e   : > { %2093 = vrcp.f32 %v1523_v43 }
 0x26f   : > { %v1529_v60 = vrot.slane %v1528_v54, 1 }
 0x271   : > { %v1530_v32 = vadd.f32 %v1529_v60, %v1528_v54 }
 0x273   : > { %2095 = vrcp.f32 %v1530_v32 }
 0x278   : > { %v2094_v1 = vpop.eup %2093 }
 0x279   : > { %v1539_v27 = vmul.f32 %v2094_v1, %v2086_v3  ;;  %v1540_v10 = vmul.f32 %v2094_v1, %v2088_v51 }
 0x27b   : > { %v1547_v53 = vmul.f32 %v3280_v31, %v1539_v27  ;;  %v1548_v22 = vmul.f32 %v3284_v15, %v1540_v10 }
 0x27d   : > { %v2096_v62 = vpop.eup %2095  ;;  %v1565_v4 = vadd.f32 %v1548_v22, %v1547_v53  ;;  %v3449_v53 = vmov 0.0  }
 0x27e   : > { %v1541_v23 = vmul.f32 %v2096_v62, %v2090_v47  ;;  %v1542_v59 = vmul.f32 %v2096_v62, %v2092_v12 }
 0x27f   : > { %v1566_v50 = vrot.slane %v1565_v4, 4 }
 0x280   : > { %v1549_v13 = vmul.f32 %v3288_v34, %v1541_v23  ;;  %v1550_v25 = vmul.f32 %v3292_v28, %v1542_v59 }
 0x281   : > { %v1567_v48 = vadd.f32 %v1566_v50, %v1565_v4 }
 0x282   : > { %v1572_v35 = vadd.f32 %v1550_v25, %v1549_v13 }
 0x283   : > { %v1568_v17 = vrot.slane %v1567_v48, 2 }
 0x284   : > { %v1573_v58 = vrot.slane %v1572_v35, 4 }
 0x285   : > { %v1569_v45 = vadd.f32 %v1568_v17, %v1567_v48 }
 0x286   : > { %v1574_v52 = vadd.f32 %v1573_v58, %v1572_v35 }
 0x287   : > { %v1570_v29 = vrot.slane %v1569_v45, 1 }
 0x288   : > { %v1575_v40 = vrot.slane %v1574_v52, 2 }
 0x289   : > { %v1571_v3 = vadd.f32 %v1570_v29, %v1569_v45 }
 0x28a   : > { %v1576_v51 = vadd.f32 %v1575_v40, %v1574_v52 }
 0x28b   : > { %v1615_v38 = vmul.f32 %v3280_v31, %v1571_v3  ;;  %v1616_v46 = vmul.f32 %v3284_v15, %v1571_v3 }
 0x28c   : > { %v1577_v47 = vrot.slane %v1576_v51, 1 }
 0x28d   : > { %1623 = vst [vmem:[%s2502_s27 + $0x98] sm:$0xff] %v1615_v38  ;;  %1624 = vst [vmem:[%s2502_s27 + $0xb8] sm:$0xff] %v1616_v46 }
 0x28e   : > { %v1578_v12 = vadd.f32 %v1577_v47, %v1576_v51 }
 0x290   : > { %v1617_v21 = vmul.f32 %v3288_v34, %v1578_v12  ;;  %v1618_v14 = vmul.f32 %v3292_v28, %v1578_v12 }
 0x292   : > { %1625 = vst [vmem:[%s2502_s27 + $0xd8] sm:$0xff] %v1617_v21  ;;  %1626 = vst [vmem:[%s2502_s27 + $0xf8] sm:$0xff] %v1618_v14 }
 0x29c   : > { %v1252_v44 = vpop.xlane.xlu0 %1251 }
 0x29d   : > { %2097 = vrcp.f32 %v1252_v44 }
 0x29e   : > { %v1254_v61 = vpop.xlane.xlu1 %1253 }
 0x29f   : > { %2099 = vrcp.f32 %v1254_v61 }
 0x2a0   : > { %v1256_v42 = vpop.xlane.xlu0 %1255 }
 0x2a1   : > { %2101 = vrcp.f32 %v1256_v42 }
 0x2a2   : > { %v1258_v2 = vpop.xlane.xlu1 %1257 }
 0x2a3   : > { %2103 = vrcp.f32 %v1258_v2 }
 0x2a7   : > { %v2098_v26 = vpop.eup %2097 }
 0x2a8   : > { %v1275_v43 = vmul.f32 %v2098_v26, %v3227_v41 }
 0x2a9   : > { %v2100_v9 = vpop.eup %2099 }
 0x2aa   : > { %v1276_v54 = vmul.f32 %v2100_v9, %v3230_v16 }
 0x2ab   : > { %v2102_v60 = vpop.eup %2101 }
 0x2ac   : > { %v1283_v32 = vpack.c.bf16 %v1276_v54, %v1275_v43  ;;  %v1277_v27 = vmul.f32 %v2102_v60, %v3233_v33 }
 0x2ad   : > { %v2104_v1 = vpop.eup %2103 }
 0x2ae   : > { %1937 = vmatmul.mubr.bf16.vlgmr.msra.gmra.mrb[8].mxu0 %v1283_v32  ;;  %v1278_v10 = vmul.f32 %v2104_v1, %v3236_v49 }
 0x2af   : > { %1961 = vmatpush3.bf16.msra.mxu0 %v2651_v55  ;;  %1976 = vmatprep.mubr.msk.bf16.mxu0 %vm3450_vm0, %v3449_v53  ;;  %v3451_v55 = vld [vmem:[#allocation11_spill] sm:$0xff] }
 0x2b0   : > { %v1284_v22 = vpack.c.bf16 %v1278_v10, %v1277_v27  ;;  %1962 = vmatprep.subr.bf16.mxu0 %v3449_v53 }
 0x2b2   : > { %1957 = vmatmul.mubr.bf16.vlgmr.msra.gmra.mrb[8].mxu1 %v1284_v22 }
 0x2b3   : > { %1963 = vmatpush3.bf16.msra.mxu0 %v2676_v7  ;;  %1981 = vmatpush3.bf16.msra.mxu1 %v2653_v56  ;;  %v3452_v56 = vld [vmem:[#allocation13_spill] sm:$0xff]  ;;  %v3453_v7 = vld [vmem:[#allocation12_spill] sm:$0xff] }
 0x2b4   : > { %1964 = vmatprep.subr.bf16.mxu0 %v3449_v53  ;;  %1982 = vmatprep.subr.bf16.mxu1 %v3449_v53 }
 0x2b5   : > { %1996 = vmatprep.mubr.msk.bf16.mxu1 %vm3450_vm0, %v3449_v53 }
 0x2b7   : > { %1965 = vmatpush3.bf16.msra.mxu0 %v2696_v18  ;;  %1983 = vmatpush3.bf16.msra.mxu1 %v2680_v8  ;;  %v3454_v8 = vld [vmem:[#allocation15_spill] sm:$0xff]  ;;  %v3455_v18 = vld [vmem:[#allocation14_spill] sm:$0xff] }
 0x2b8   : > { %1966 = vmatprep.subr.bf16.mxu0 %v3449_v53  ;;  %1984 = vmatprep.subr.bf16.mxu1 %v3449_v53 }
 0x2bb   : > { %1967 = vmatpush3.bf16.msra.mxu0 %v2712_v37  ;;  %1985 = vmatpush3.bf16.msra.mxu1 %v2698_v19  ;;  %v3456_v19 = vld [vmem:[#allocation16_spill] sm:$0xff] }
 0x2bc   : > { %1968 = vmatprep.subr.bf16.mxu0 %v3449_v53  ;;  %1986 = vmatprep.subr.bf16.mxu1 %v3449_v53 }
 0x2bf   : > { %1969 = vmatpush3.bf16.msra.mxu0 %v2728_v57  ;;  %1987 = vmatpush3.bf16.msra.mxu1 %v2714_v39 }
 0x2c0   : > { %1970 = vmatprep.subr.bf16.mxu0 %v3449_v53  ;;  %1988 = vmatprep.subr.bf16.mxu1 %v3449_v53 }
 0x2c3   : > { %1971 = vmatpush3.bf16.msra.mxu0 %v2744_v20  ;;  %1989 = vmatpush3.bf16.msra.mxu1 %v3451_v55 }
 0x2c4   : > { %1972 = vmatprep.subr.bf16.mxu0 %v3449_v53  ;;  %1990 = vmatprep.subr.bf16.mxu1 %v3449_v53 }
 0x2c7   : > { %1973 = vmatpush3.bf16.msra.mxu0 %v3452_v56  ;;  %1991 = vmatpush3.bf16.msra.mxu1 %v3453_v7 }
 0x2c8   : > { %1974 = vmatprep.subr.bf16.mxu0 %v3449_v53  ;;  %1992 = vmatprep.subr.bf16.mxu1 %v3449_v53 }
 0x2cb   : > { %1975 = vmatpush3.bf16.msra.mxu0 %v3454_v8  ;;  %1993 = vmatpush3.bf16.msra.mxu1 %v3455_v18 }
 0x2cc   : > { %1994 = vmatprep.subr.bf16.mxu1 %v3449_v53 }
 0x2cf   : > { %1995 = vmatpush3.bf16.msra.mxu1 %v3456_v19 }
 0x2dc   : > { %v1260_v37 = vpop.xlane.xlu0 %1259 }
 0x2dd   : > { %2105 = vrcp.f32 %v1260_v37 }
 0x2de   : > { %v1262_v39 = vpop.xlane.xlu1 %1261 }
 0x2df   : > { %2107 = vrcp.f32 %v1262_v39 }
 0x2e1   : > { %v1264_v57 = vpop.xlane.xlu0 %1263 }
 0x2e2   : > { %2109 = vrcp.f32 %v1264_v57  ;;  %v1266_v20 = vpop.xlane.xlu1 %1265 }
 0x2e3   : > { %2111 = vrcp.f32 %v1266_v20 }
 0x2e7   : > { %v2106_v41 = vpop.eup %2105 }
 0x2e8   : > { %v1279_v33 = vmul.f32 %v2106_v41, %v3263_v36 }
 0x2e9   : > { %v2108_v16 = vpop.eup %2107 }
 0x2ea   : > { %v1280_v49 = vmul.f32 %v2108_v16, %v3266_v11 }
 0x2ec   : > { %v2110_v62 = vpop.eup %2109  ;;  %v1285_v4 = vpack.c.bf16 %v1280_v49, %v1279_v33 }
 0x2ed   : > { %v2112_v23 = vpop.eup %2111  ;;  %v1281_v59 = vmul.f32 %v2110_v62, %v3273_v5 }
 0x2ee   : > { %1977 = vmatmul.mubr.bf16.vlgmr.msra.gmra.mrb[12].mxu0 %v1285_v4  ;;  %v1282_v50 = vmul.f32 %v2112_v23, %v3275_v30 }
 0x2f0   : > { %v1286_v13 = vpack.c.bf16 %v1282_v50, %v1281_v59 }
 0x2f2   : > { %1997 = vmatmul.mubr.bf16.vlgmr.msra.gmra.mrb[12].mxu1 %v1286_v13 }
 0x381   : > { %v1321_v25 = vpop.f32.mrb[8].mxu0 }
 0x382   : > { %1587 = vst [vmem:[%s2502_s27 + $0x8] sm:$0xff] %v1321_v25  ;;  %v1595_v36 = vmul.f32 %v3240_v6, %v1321_v25  ;;  %v1938_v48 = vpop.f32.mrb[9].mxu0 }
 0x383   : > { %v1324_v11 = vpop.f32.mrb[10].mxu0 }
 0x384   : > { %1603 = vst [vmem:[%s2502_s27 + $0x10] sm:$0xff] %v1595_v36  ;;  %1588 = vst [vmem:[%s2502_s27 + $0x28] sm:$0xff] %v1324_v11  ;;  %v1596_v35 = vmul.f32 %v3244_v63, %v1324_v11  ;;  %v1939_v17 = vpop.f32.mrb[11].mxu0 }
 0x385   : > { %v1362_v5 = vpop.f32.mrb[8].mxu1 }
 0x386   : > { %1604 = vst [vmem:[%s2502_s27 + $0x30] sm:$0xff] %v1596_v35  ;;  %1589 = vst [vmem:[%s2502_s27 + $0x48] sm:$0xff] %v1362_v5  ;;  %v1597_v30 = vmul.f32 %v3248_v24, %v1362_v5  ;;  %v1958_v58 = vpop.f32.mrb[9].mxu1 }
 0x387   : > { %v1365_v45 = vpop.f32.mrb[10].mxu1 }
 0x388   : > { %1605 = vst [vmem:[%s2502_s27 + $0x50] sm:$0xff] %v1597_v30  ;;  %1590 = vst [vmem:[%s2502_s27 + $0x68] sm:$0xff] %v1365_v45  ;;  %v1598_v6 = vmul.f32 %v3252_v0, %v1365_v45  ;;  %v1959_v52 = vpop.f32.mrb[11].mxu1 }
 0x38a   : > { %1606 = vst [vmem:[%s2502_s27 + $0x70] sm:$0xff] %v1598_v6 }
 0x3c1   : > { %v1403_v63 = vpop.f32.mrb[12].mxu0 }
 0x3c2   : > { %1591 = vst [vmem:[%s2502_s27 + $0x88] sm:$0xff] %v1403_v63  ;;  %v1599_v29 = vmul.f32 %v3280_v31, %v1403_v63  ;;  %v1978_v40 = vpop.f32.mrb[13].mxu0 }
 0x3c3   : > { %v1406_v3 = vpop.f32.mrb[14].mxu0 }
 0x3c4   : > { %1607 = vst [vmem:[%s2502_s27 + $0x90] sm:$0xff] %v1599_v29  ;;  %1592 = vst [vmem:[%s2502_s27 + $0xa8] sm:$0xff] %v1406_v3  ;;  %v1600_v24 = vmul.f32 %v3284_v15, %v1406_v3  ;;  %v1979_v51 = vpop.f32.mrb[15].mxu0 }
 0x3c5   : > { %v1444_v0 = vpop.f32.mrb[12].mxu1 }
 0x3c6   : > { %1608 = vst [vmem:[%s2502_s27 + $0xb0] sm:$0xff] %v1600_v24  ;;  %1593 = vst [vmem:[%s2502_s27 + $0xc8] sm:$0xff] %v1444_v0  ;;  %v1601_v38 = vmul.f32 %v3288_v34, %v1444_v0  ;;  %v1998_v31 = vpop.f32.mrb[13].mxu1 }
 0x3c7   : > { %v1447_v46 = vpop.f32.mrb[14].mxu1 }
 0x3c8   : > { %1609 = vst [vmem:[%s2502_s27 + $0xd0] sm:$0xff] %v1601_v38  ;;  %1594 = vst [vmem:[%s2502_s27 + $0xe8] sm:$0xff] %v1447_v46  ;;  %v1602_v15 = vmul.f32 %v3292_v28, %v1447_v46  ;;  %v1999_v47 = vpop.f32.mrb[15].mxu1 }
 0x3ca   : > { %1610 = vst [vmem:[%s2502_s27 + $0xf0] sm:$0xff] %v1602_v15 }
 0x3cb   : > { %2194 = shalt.err (!%p2191_p11)
}
 0x3cc   : > { %s2195_s23 = scalar_lea.hbm %s3370_s29, 4096  ;;  %s2199_s27 = scalar_lea.hbm %s3423_s3, 8192 }
 0x3cd   : > { %p2196_p3 = scmp.ne.s32.totalorder %s3370_s29, %s2195_s23  ;;  %p2200_p2 = scmp.lt.u32.totalorder %s3370_s29, %s3423_s3 }
 0x3ce   : > { %p2201_p4 = scmp.lt.u32.totalorder %s2199_s27, %s2195_s23  ;;  %p2203_p13 = scmp.lt.u32.totalorder %s2195_s23, %s3370_s29 }
 0x3cf   : > { %p2197_p8 = pnand %p2196_p3, %p3457_p1 }
 0x3d0   : > { %p2202_p6 = por %p2201_p4, %p2200_p2 }
 0x3d1   : > { %p2198_p0 = pneg %p2197_p8 }
 0x3d2   : > { %p2204_p12 = por %p2203_p13, %p2202_p6 }
 0x3d4   : > { %p2205_p10 = pnand %p2204_p12, %p2198_p0 }
 0x3d6   : > { %2208 = shalt.err (!%p2205_p10)
}
 0x3d7   : > { %s2260_s11 = smov 512   ;;  %s2261_s17 = smov 32  }
 0x3d8   : > { %2004 = dma.vmem_to_hbm [thread:$0]  (%p3457_p1), %s3372_s22, 4096, %s3370_s29, %s1628_s16, %s2260_s11, %s2260_s11, %s2261_s17  }
 0x3d9 PF: > { %s1657_s20 = sand.u32 1, %s2239_s12   ;;  %p3458_p5 = scmp.ne.s32.totalorder %s3439_s25, 0 }
 0x3da   : > { %p3459_p7 = scmp.ge.s32.totalorder %s2251_s15, 2  ;;  %s1658_s8 = scalar_lea.sflag [#allocation4], %s1657_s20 }
 0x3dc   : > { %p2014_p9 = pnand %p3459_p7, %p3458_p5 }
 0x3de   : > { %2234 = dma.done.wait (!%p2014_p9), %s1658_s8, 4096  }
 0x3df   : > { %2236 = vsyncadd (!%p2014_p9), %s1658_s8, 4294963200  ;;  %p19_p11 = scmp.ge.s32.totalorder %s2307_s18, 4   ;;  %s3460_s12 = smov %s2243_s13 }
 0x3e0   : > { %s3461_s13 = smov %s2247_s14  ;;  %s3462_s14 = smov %s2319_s21 }
 0x3e1   : > { %s3463_s15 = smov %s2307_s18  ;;  %21 = sbr.rel (!%p19_p11) target bundleno = 7 (0x7), region = 90 }
 0x3e8   :  { %1663 = vsyncpa [#allocation3], 1 }
 0x3e9   :  { %1665 = vsyncpa [#allocation3 + $0x1], 1 }
 0x3ea   :  { %1666 = vsyncpa [#allocation6], 1 }
 0x3eb   :  { %1668 = vsyncpa [#allocation6 + $0x1], 1 }
 0x3ec   :  { %1669 = vsyncpa [#allocation4], 1 }
 0x3ed   :  { %1671 = vsyncpa [#allocation4 + $0x1], 1 }

</bundles_post_ra>
